<compile_context>
chip_gen: v6e
topology: v6e:2x2x1
jax: 0.10.0
libtpu: 0.0.40
codegen_flags: <defaults>
</compile_context>

<pallas_src>
import math

import jax
import jax.numpy as jnp
from jax.experimental import pallas as pl
from jax.experimental.pallas import tpu as pltpu

INPUT_SIZE = 11
HIDDEN_SIZE = 16
NUM_LAYERS = 2


def lstm_softmax_kernel(x2d_ref, wih0_ref, whh0_ref, b0_ref,
                        wcat1_ref, b1_ref, out_ref):
    # x2d_ref: (T*B, I), time-major rows: row t*B + b == (timestep t, batch b)
    TB, _ = x2d_ref.shape
    H = whh0_ref.shape[0]
    B = out_ref.shape[0]
    T = TB // B

    whh0 = whh0_ref[...]                      # (H, 4H)
    wcat1 = wcat1_ref[...]                    # (2H, 4H) = [Wih1; Whh1]
    b1 = b1_ref[...]                          # (1, 4H)

    # Layer-0 input projection hoisted out of the recurrence: one MXU pass
    # over all timesteps (bias b0 folded in here).
    xp = (jnp.dot(x2d_ref[...], wih0_ref[...],
                  preferred_element_type=jnp.float32)
          + b0_ref[...])                      # (T*B, 4H)

    def cell(gates, c):
        # Two whole-array transcendentals instead of four sliced ones.
        sig = jax.nn.sigmoid(gates)
        th = jnp.tanh(gates)
        i = sig[:, 0:H]
        f = sig[:, H:2 * H]
        g = th[:, 2 * H:3 * H]
        o = sig[:, 3 * H:4 * H]
        c_new = f * c + i * g
        h_new = o * jnp.tanh(c_new)
        return h_new, c_new

    z = jnp.zeros((B, H), jnp.float32)
    h0, c0, h1, c1 = z, z, z, z

    # Fully unrolled time loop (T is small and static).
    for t in range(T):
        # layer 0: only the recurrent dot remains on the serial chain.
        gates0 = xp[t * B:(t + 1) * B, :] + jnp.dot(
            h0, whh0, preferred_element_type=jnp.float32)
        h0, c0 = cell(gates0, c0)
        # layer 1: single fused dot over concatenated [h0_new, h1_prev].
        gates1 = jnp.dot(jnp.concatenate([h0, h1], axis=1), wcat1,
                         preferred_element_type=jnp.float32) + b1
        h1, c1 = cell(gates1, c1)

    # Dropout2d(p=0.05) is identity in eval/inference mode.
    logits = h1                               # last timestep, top LSTM layer
    m = jnp.max(logits, axis=1, keepdims=True)
    e = jnp.exp(logits - m)
    denom = jnp.sum(e, axis=1, keepdims=True)
    out_ref[...] = e * pl.reciprocal(denom, approx=False)


def rnn_forward(x, params):
    """x: (B, T, INPUT_SIZE) float32, batch_first (PyTorch convention)."""
    B, T, I = x.shape
    assert I == INPUT_SIZE
    wih0, whh0, b0, wih1, whh1, b1 = params
    # Tiny layout prep in XLA: time-major flatten of x (704 B here) and the
    # fused layer-1 weight [Wih1; Whh1] along K.
    x2d = jnp.transpose(x, (1, 0, 2)).reshape(T * B, I).astype(jnp.float32)
    wcat1 = jnp.concatenate([wih1, whh1], axis=0)        # (2H, 4H)
    vmem = pl.BlockSpec(memory_space=pltpu.MemorySpace.VMEM)
    return pl.pallas_call(
        lstm_softmax_kernel,
        out_shape=jax.ShapeDtypeStruct((B, HIDDEN_SIZE), jnp.float32),
        in_specs=[vmem] * 6,
        out_specs=vmem,
    )(x2d, wih0, whh0, b0, wcat1, b1)


def init_params(key):
    """Deterministic init matching PyTorch LSTM param shapes (transposed)."""
    k = 1.0 / math.sqrt(HIDDEN_SIZE)
    keys = jax.random.split(key, 8)

    def u(kk, shape):
        return jax.random.uniform(kk, shape, jnp.float32, minval=-k, maxval=k)

    # layer 0: weight_ih_l0 (4H, I), weight_hh_l0 (4H, H), biases (4H,)
    wih0 = u(keys[0], (4 * HIDDEN_SIZE, INPUT_SIZE)).T          # (I, 4H)
    whh0 = u(keys[1], (4 * HIDDEN_SIZE, HIDDEN_SIZE)).T         # (H, 4H)
    b0 = (u(keys[2], (4 * HIDDEN_SIZE,)) +
          u(keys[3], (4 * HIDDEN_SIZE,))).reshape(1, -1)        # (1, 4H)
    # layer 1: weight_ih_l1 (4H, H)
    wih1 = u(keys[4], (4 * HIDDEN_SIZE, HIDDEN_SIZE)).T         # (H, 4H)
    whh1 = u(keys[5], (4 * HIDDEN_SIZE, HIDDEN_SIZE)).T         # (H, 4H)
    b1 = (u(keys[6], (4 * HIDDEN_SIZE,)) +
          u(keys[7], (4 * HIDDEN_SIZE,))).reshape(1, -1)        # (1, 4H)
    return (wih0, whh0, b0, wih1, whh1, b1)


def rnn_reference(x, params):
    """Pure-JAX reference for the same forward pass."""
    wih0, whh0, b0, wih1, whh1, b1 = params
    B = x.shape[0]
    H = HIDDEN_SIZE

    def cell(x_t, h, c, wih, whh, b):
        gates = x_t @ wih + h @ whh + b
        i = jax.nn.sigmoid(gates[:, 0:H])
        f = jax.nn.sigmoid(gates[:, H:2 * H])
        g = jnp.tanh(gates[:, 2 * H:3 * H])
        o = jax.nn.sigmoid(gates[:, 3 * H:4 * H])
        c = f * c + i * g
        return o * jnp.tanh(c), c

    def step(carry, x_t):
        h0, c0, h1, c1 = carry
        h0, c0 = cell(x_t, h0, c0, wih0, whh0, b0)
        h1, c1 = cell(h0, h1, c1, wih1, whh1, b1)
        return (h0, c0, h1, c1), None

    z = jnp.zeros((B, H), jnp.float32)
    (_, _, h1, _), _ = jax.lax.scan(step, (z, z, z, z),
                                    jnp.transpose(x, (1, 0, 2)))
    return jax.nn.softmax(h1, axis=1)


if __name__ == "__main__":
    key = jax.random.PRNGKey(0)
    pkey, xkey = jax.random.split(key)
    params = init_params(pkey)

    B, T = 2, 8
    x = jax.random.normal(xkey, (B, T, INPUT_SIZE), jnp.float32)

    out = jax.jit(rnn_forward)(x, params)
    out = jax.block_until_ready(out)

    ref = rnn_reference(x, params)
    assert out.shape == (B, HIDDEN_SIZE)
    assert jnp.allclose(jnp.sum(out, axis=1), 1.0, atol=1e-5)
    assert jnp.allclose(out, ref, atol=1e-5, rtol=1e-5)

    print("KERNEL_OK")
</pallas_src>

<mosaic_0001>
module attributes {stable_mosaic.version = 11 : i64} {
  func.func @lstm_softmax_kernel(%arg0: memref<16x11xf32, #tpu.memory_space<vmem>>, %arg1: memref<11x64xf32, #tpu.memory_space<vmem>>, %arg2: memref<16x64xf32, #tpu.memory_space<vmem>>, %arg3: memref<1x64xf32, #tpu.memory_space<vmem>>, %arg4: memref<32x64xf32, #tpu.memory_space<vmem>>, %arg5: memref<1x64xf32, #tpu.memory_space<vmem>>, %arg6: memref<2x16xf32, #tpu.memory_space<vmem>>) attributes {dimension_semantics = [], scalar_prefetch = 0 : i64, scratch_operands = 0 : i64, tpu.core_type = #tpu.core_type<tc>} {
    %c0 = arith.constant 0 : index
    %c0_0 = arith.constant 0 : index
    %0 = vector.load %arg2[%c0, %c0_0] : memref<16x64xf32, #tpu.memory_space<vmem>>, vector<16x64xf32>
    %c0_1 = arith.constant 0 : index
    %c0_2 = arith.constant 0 : index
    %1 = vector.load %arg4[%c0_1, %c0_2] : memref<32x64xf32, #tpu.memory_space<vmem>>, vector<32x64xf32>
    %c0_3 = arith.constant 0 : index
    %c0_4 = arith.constant 0 : index
    %2 = vector.load %arg5[%c0_3, %c0_4] : memref<1x64xf32, #tpu.memory_space<vmem>>, vector<1x64xf32>
    %c0_5 = arith.constant 0 : index
    %c0_6 = arith.constant 0 : index
    %3 = vector.load %arg0[%c0_5, %c0_6] : memref<16x11xf32, #tpu.memory_space<vmem>>, vector<16x11xf32>
    %c0_7 = arith.constant 0 : index
    %c0_8 = arith.constant 0 : index
    %4 = vector.load %arg1[%c0_7, %c0_8] : memref<11x64xf32, #tpu.memory_space<vmem>>, vector<11x64xf32>
    %cst = arith.constant dense<0.000000e+00> : vector<16x64xf32>
    %5 = tpu.matmul %3, %4, %cst {dimension_numbers = #tpu.dot_dimension_numbers<[1], [0], [0], [1], [0, 0, 1, 1], [], []>} : vector<16x11xf32>, vector<11x64xf32>, vector<16x64xf32> -> vector<16x64xf32>
    %c0_9 = arith.constant 0 : index
    %c0_10 = arith.constant 0 : index
    %6 = vector.load %arg3[%c0_9, %c0_10] : memref<1x64xf32, #tpu.memory_space<vmem>>, vector<1x64xf32>
    %7 = vector.broadcast %6 : vector<1x64xf32> to vector<16x64xf32>
    %8 = arith.addf %5, %7 : vector<16x64xf32>
    %cst_11 = arith.constant 0.000000e+00 : f32
    %9 = vector.broadcast %cst_11 : f32 to vector<2x16xf32>
    %10 = vector.extract_strided_slice %8 {offsets = [0, 0], sizes = [2, 64], strides = [1, 1]} : vector<16x64xf32> to vector<2x64xf32>
    %cst_12 = arith.constant dense<0.000000e+00> : vector<2x64xf32>
    %11 = tpu.matmul %9, %0, %cst_12 {dimension_numbers = #tpu.dot_dimension_numbers<[1], [0], [0], [1], [0, 0, 1, 1], [], []>} : vector<2x16xf32>, vector<16x64xf32>, vector<2x64xf32> -> vector<2x64xf32>
    %12 = arith.addf %10, %11 : vector<2x64xf32>
    %13 = arith.negf %12 : vector<2x64xf32>
    %14 = math.exp %13 : vector<2x64xf32>
    %cst_13 = arith.constant 1.000000e+00 : f32
    %15 = vector.broadcast %cst_13 : f32 to vector<2x64xf32>
    %16 = arith.addf %15, %14 : vector<2x64xf32>
    %17 = arith.divf %15, %16 : vector<2x64xf32>
    %18 = math.tanh %12 : vector<2x64xf32>
    %19 = vector.extract_strided_slice %17 {offsets = [0, 0], sizes = [2, 16], strides = [1, 1]} : vector<2x64xf32> to vector<2x16xf32>
    %20 = vector.extract_strided_slice %17 {offsets = [0, 16], sizes = [2, 16], strides = [1, 1]} : vector<2x64xf32> to vector<2x16xf32>
    %21 = vector.extract_strided_slice %18 {offsets = [0, 32], sizes = [2, 16], strides = [1, 1]} : vector<2x64xf32> to vector<2x16xf32>
    %22 = vector.extract_strided_slice %17 {offsets = [0, 48], sizes = [2, 16], strides = [1, 1]} : vector<2x64xf32> to vector<2x16xf32>
    %23 = arith.mulf %20, %9 : vector<2x16xf32>
    %24 = arith.mulf %19, %21 : vector<2x16xf32>
    %25 = arith.addf %23, %24 : vector<2x16xf32>
    %26 = math.tanh %25 : vector<2x16xf32>
    %27 = arith.mulf %22, %26 : vector<2x16xf32>
    %28 = tpu.concatenate %27, %9 in 1 : vector<2x16xf32>, vector<2x16xf32> -> vector<2x32xf32>
    %cst_14 = arith.constant dense<0.000000e+00> : vector<2x64xf32>
    %29 = tpu.matmul %28, %1, %cst_14 {dimension_numbers = #tpu.dot_dimension_numbers<[1], [0], [0], [1], [0, 0, 1, 1], [], []>} : vector<2x32xf32>, vector<32x64xf32>, vector<2x64xf32> -> vector<2x64xf32>
    %30 = vector.broadcast %2 : vector<1x64xf32> to vector<2x64xf32>
    %31 = arith.addf %29, %30 : vector<2x64xf32>
    %32 = arith.negf %31 : vector<2x64xf32>
    %33 = math.exp %32 : vector<2x64xf32>
    %cst_15 = arith.constant 1.000000e+00 : f32
    %34 = vector.broadcast %cst_15 : f32 to vector<2x64xf32>
    %35 = arith.addf %34, %33 : vector<2x64xf32>
    %36 = arith.divf %34, %35 : vector<2x64xf32>
    %37 = math.tanh %31 : vector<2x64xf32>
    %38 = vector.extract_strided_slice %36 {offsets = [0, 0], sizes = [2, 16], strides = [1, 1]} : vector<2x64xf32> to vector<2x16xf32>
    %39 = vector.extract_strided_slice %36 {offsets = [0, 16], sizes = [2, 16], strides = [1, 1]} : vector<2x64xf32> to vector<2x16xf32>
    %40 = vector.extract_strided_slice %37 {offsets = [0, 32], sizes = [2, 16], strides = [1, 1]} : vector<2x64xf32> to vector<2x16xf32>
    %41 = vector.extract_strided_slice %36 {offsets = [0, 48], sizes = [2, 16], strides = [1, 1]} : vector<2x64xf32> to vector<2x16xf32>
    %42 = arith.mulf %39, %9 : vector<2x16xf32>
    %43 = arith.mulf %38, %40 : vector<2x16xf32>
    %44 = arith.addf %42, %43 : vector<2x16xf32>
    %45 = math.tanh %44 : vector<2x16xf32>
    %46 = arith.mulf %41, %45 : vector<2x16xf32>
    %47 = vector.extract_strided_slice %8 {offsets = [2, 0], sizes = [2, 64], strides = [1, 1]} : vector<16x64xf32> to vector<2x64xf32>
    %cst_16 = arith.constant dense<0.000000e+00> : vector<2x64xf32>
    %48 = tpu.matmul %27, %0, %cst_16 {dimension_numbers = #tpu.dot_dimension_numbers<[1], [0], [0], [1], [0, 0, 1, 1], [], []>} : vector<2x16xf32>, vector<16x64xf32>, vector<2x64xf32> -> vector<2x64xf32>
    %49 = arith.addf %47, %48 : vector<2x64xf32>
    %50 = arith.negf %49 : vector<2x64xf32>
    %51 = math.exp %50 : vector<2x64xf32>
    %cst_17 = arith.constant 1.000000e+00 : f32
    %52 = vector.broadcast %cst_17 : f32 to vector<2x64xf32>
    %53 = arith.addf %52, %51 : vector<2x64xf32>
    %54 = arith.divf %52, %53 : vector<2x64xf32>
    %55 = math.tanh %49 : vector<2x64xf32>
    %56 = vector.extract_strided_slice %54 {offsets = [0, 0], sizes = [2, 16], strides = [1, 1]} : vector<2x64xf32> to vector<2x16xf32>
    %57 = vector.extract_strided_slice %54 {offsets = [0, 16], sizes = [2, 16], strides = [1, 1]} : vector<2x64xf32> to vector<2x16xf32>
    %58 = vector.extract_strided_slice %55 {offsets = [0, 32], sizes = [2, 16], strides = [1, 1]} : vector<2x64xf32> to vector<2x16xf32>
    %59 = vector.extract_strided_slice %54 {offsets = [0, 48], sizes = [2, 16], strides = [1, 1]} : vector<2x64xf32> to vector<2x16xf32>
    %60 = arith.mulf %57, %25 : vector<2x16xf32>
    %61 = arith.mulf %56, %58 : vector<2x16xf32>
    %62 = arith.addf %60, %61 : vector<2x16xf32>
    %63 = math.tanh %62 : vector<2x16xf32>
    %64 = arith.mulf %59, %63 : vector<2x16xf32>
    %65 = tpu.concatenate %64, %46 in 1 : vector<2x16xf32>, vector<2x16xf32> -> vector<2x32xf32>
    %cst_18 = arith.constant dense<0.000000e+00> : vector<2x64xf32>
    %66 = tpu.matmul %65, %1, %cst_18 {dimension_numbers = #tpu.dot_dimension_numbers<[1], [0], [0], [1], [0, 0, 1, 1], [], []>} : vector<2x32xf32>, vector<32x64xf32>, vector<2x64xf32> -> vector<2x64xf32>
    %67 = vector.broadcast %2 : vector<1x64xf32> to vector<2x64xf32>
    %68 = arith.addf %66, %67 : vector<2x64xf32>
    %69 = arith.negf %68 : vector<2x64xf32>
    %70 = math.exp %69 : vector<2x64xf32>
    %cst_19 = arith.constant 1.000000e+00 : f32
    %71 = vector.broadcast %cst_19 : f32 to vector<2x64xf32>
    %72 = arith.addf %71, %70 : vector<2x64xf32>
    %73 = arith.divf %71, %72 : vector<2x64xf32>
    %74 = math.tanh %68 : vector<2x64xf32>
    %75 = vector.extract_strided_slice %73 {offsets = [0, 0], sizes = [2, 16], strides = [1, 1]} : vector<2x64xf32> to vector<2x16xf32>
    %76 = vector.extract_strided_slice %73 {offsets = [0, 16], sizes = [2, 16], strides = [1, 1]} : vector<2x64xf32> to vector<2x16xf32>
    %77 = vector.extract_strided_slice %74 {offsets = [0, 32], sizes = [2, 16], strides = [1, 1]} : vector<2x64xf32> to vector<2x16xf32>
    %78 = vector.extract_strided_slice %73 {offsets = [0, 48], sizes = [2, 16], strides = [1, 1]} : vector<2x64xf32> to vector<2x16xf32>
    %79 = arith.mulf %76, %44 : vector<2x16xf32>
    %80 = arith.mulf %75, %77 : vector<2x16xf32>
    %81 = arith.addf %79, %80 : vector<2x16xf32>
    %82 = math.tanh %81 : vector<2x16xf32>
    %83 = arith.mulf %78, %82 : vector<2x16xf32>
    %84 = vector.extract_strided_slice %8 {offsets = [4, 0], sizes = [2, 64], strides = [1, 1]} : vector<16x64xf32> to vector<2x64xf32>
    %cst_20 = arith.constant dense<0.000000e+00> : vector<2x64xf32>
    %85 = tpu.matmul %64, %0, %cst_20 {dimension_numbers = #tpu.dot_dimension_numbers<[1], [0], [0], [1], [0, 0, 1, 1], [], []>} : vector<2x16xf32>, vector<16x64xf32>, vector<2x64xf32> -> vector<2x64xf32>
    %86 = arith.addf %84, %85 : vector<2x64xf32>
    %87 = arith.negf %86 : vector<2x64xf32>
    %88 = math.exp %87 : vector<2x64xf32>
    %cst_21 = arith.constant 1.000000e+00 : f32
    %89 = vector.broadcast %cst_21 : f32 to vector<2x64xf32>
    %90 = arith.addf %89, %88 : vector<2x64xf32>
    %91 = arith.divf %89, %90 : vector<2x64xf32>
    %92 = math.tanh %86 : vector<2x64xf32>
    %93 = vector.extract_strided_slice %91 {offsets = [0, 0], sizes = [2, 16], strides = [1, 1]} : vector<2x64xf32> to vector<2x16xf32>
    %94 = vector.extract_strided_slice %91 {offsets = [0, 16], sizes = [2, 16], strides = [1, 1]} : vector<2x64xf32> to vector<2x16xf32>
    %95 = vector.extract_strided_slice %92 {offsets = [0, 32], sizes = [2, 16], strides = [1, 1]} : vector<2x64xf32> to vector<2x16xf32>
    %96 = vector.extract_strided_slice %91 {offsets = [0, 48], sizes = [2, 16], strides = [1, 1]} : vector<2x64xf32> to vector<2x16xf32>
    %97 = arith.mulf %94, %62 : vector<2x16xf32>
    %98 = arith.mulf %93, %95 : vector<2x16xf32>
    %99 = arith.addf %97, %98 : vector<2x16xf32>
    %100 = math.tanh %99 : vector<2x16xf32>
    %101 = arith.mulf %96, %100 : vector<2x16xf32>
    %102 = tpu.concatenate %101, %83 in 1 : vector<2x16xf32>, vector<2x16xf32> -> vector<2x32xf32>
    %cst_22 = arith.constant dense<0.000000e+00> : vector<2x64xf32>
    %103 = tpu.matmul %102, %1, %cst_22 {dimension_numbers = #tpu.dot_dimension_numbers<[1], [0], [0], [1], [0, 0, 1, 1], [], []>} : vector<2x32xf32>, vector<32x64xf32>, vector<2x64xf32> -> vector<2x64xf32>
    %104 = vector.broadcast %2 : vector<1x64xf32> to vector<2x64xf32>
    %105 = arith.addf %103, %104 : vector<2x64xf32>
    %106 = arith.negf %105 : vector<2x64xf32>
    %107 = math.exp %106 : vector<2x64xf32>
    %cst_23 = arith.constant 1.000000e+00 : f32
    %108 = vector.broadcast %cst_23 : f32 to vector<2x64xf32>
    %109 = arith.addf %108, %107 : vector<2x64xf32>
    %110 = arith.divf %108, %109 : vector<2x64xf32>
    %111 = math.tanh %105 : vector<2x64xf32>
    %112 = vector.extract_strided_slice %110 {offsets = [0, 0], sizes = [2, 16], strides = [1, 1]} : vector<2x64xf32> to vector<2x16xf32>
    %113 = vector.extract_strided_slice %110 {offsets = [0, 16], sizes = [2, 16], strides = [1, 1]} : vector<2x64xf32> to vector<2x16xf32>
    %114 = vector.extract_strided_slice %111 {offsets = [0, 32], sizes = [2, 16], strides = [1, 1]} : vector<2x64xf32> to vector<2x16xf32>
    %115 = vector.extract_strided_slice %110 {offsets = [0, 48], sizes = [2, 16], strides = [1, 1]} : vector<2x64xf32> to vector<2x16xf32>
    %116 = arith.mulf %113, %81 : vector<2x16xf32>
    %117 = arith.mulf %112, %114 : vector<2x16xf32>
    %118 = arith.addf %116, %117 : vector<2x16xf32>
    %119 = math.tanh %118 : vector<2x16xf32>
    %120 = arith.mulf %115, %119 : vector<2x16xf32>
    %121 = vector.extract_strided_slice %8 {offsets = [6, 0], sizes = [2, 64], strides = [1, 1]} : vector<16x64xf32> to vector<2x64xf32>
    %cst_24 = arith.constant dense<0.000000e+00> : vector<2x64xf32>
    %122 = tpu.matmul %101, %0, %cst_24 {dimension_numbers = #tpu.dot_dimension_numbers<[1], [0], [0], [1], [0, 0, 1, 1], [], []>} : vector<2x16xf32>, vector<16x64xf32>, vector<2x64xf32> -> vector<2x64xf32>
    %123 = arith.addf %121, %122 : vector<2x64xf32>
    %124 = arith.negf %123 : vector<2x64xf32>
    %125 = math.exp %124 : vector<2x64xf32>
    %cst_25 = arith.constant 1.000000e+00 : f32
    %126 = vector.broadcast %cst_25 : f32 to vector<2x64xf32>
    %127 = arith.addf %126, %125 : vector<2x64xf32>
    %128 = arith.divf %126, %127 : vector<2x64xf32>
    %129 = math.tanh %123 : vector<2x64xf32>
    %130 = vector.extract_strided_slice %128 {offsets = [0, 0], sizes = [2, 16], strides = [1, 1]} : vector<2x64xf32> to vector<2x16xf32>
    %131 = vector.extract_strided_slice %128 {offsets = [0, 16], sizes = [2, 16], strides = [1, 1]} : vector<2x64xf32> to vector<2x16xf32>
    %132 = vector.extract_strided_slice %129 {offsets = [0, 32], sizes = [2, 16], strides = [1, 1]} : vector<2x64xf32> to vector<2x16xf32>
    %133 = vector.extract_strided_slice %128 {offsets = [0, 48], sizes = [2, 16], strides = [1, 1]} : vector<2x64xf32> to vector<2x16xf32>
    %134 = arith.mulf %131, %99 : vector<2x16xf32>
    %135 = arith.mulf %130, %132 : vector<2x16xf32>
    %136 = arith.addf %134, %135 : vector<2x16xf32>
    %137 = math.tanh %136 : vector<2x16xf32>
    %138 = arith.mulf %133, %137 : vector<2x16xf32>
    %139 = tpu.concatenate %138, %120 in 1 : vector<2x16xf32>, vector<2x16xf32> -> vector<2x32xf32>
    %cst_26 = arith.constant dense<0.000000e+00> : vector<2x64xf32>
    %140 = tpu.matmul %139, %1, %cst_26 {dimension_numbers = #tpu.dot_dimension_numbers<[1], [0], [0], [1], [0, 0, 1, 1], [], []>} : vector<2x32xf32>, vector<32x64xf32>, vector<2x64xf32> -> vector<2x64xf32>
    %141 = vector.broadcast %2 : vector<1x64xf32> to vector<2x64xf32>
    %142 = arith.addf %140, %141 : vector<2x64xf32>
    %143 = arith.negf %142 : vector<2x64xf32>
    %144 = math.exp %143 : vector<2x64xf32>
    %cst_27 = arith.constant 1.000000e+00 : f32
    %145 = vector.broadcast %cst_27 : f32 to vector<2x64xf32>
    %146 = arith.addf %145, %144 : vector<2x64xf32>
    %147 = arith.divf %145, %146 : vector<2x64xf32>
    %148 = math.tanh %142 : vector<2x64xf32>
    %149 = vector.extract_strided_slice %147 {offsets = [0, 0], sizes = [2, 16], strides = [1, 1]} : vector<2x64xf32> to vector<2x16xf32>
    %150 = vector.extract_strided_slice %147 {offsets = [0, 16], sizes = [2, 16], strides = [1, 1]} : vector<2x64xf32> to vector<2x16xf32>
    %151 = vector.extract_strided_slice %148 {offsets = [0, 32], sizes = [2, 16], strides = [1, 1]} : vector<2x64xf32> to vector<2x16xf32>
    %152 = vector.extract_strided_slice %147 {offsets = [0, 48], sizes = [2, 16], strides = [1, 1]} : vector<2x64xf32> to vector<2x16xf32>
    %153 = arith.mulf %150, %118 : vector<2x16xf32>
    %154 = arith.mulf %149, %151 : vector<2x16xf32>
    %155 = arith.addf %153, %154 : vector<2x16xf32>
    %156 = math.tanh %155 : vector<2x16xf32>
    %157 = arith.mulf %152, %156 : vector<2x16xf32>
    %158 = vector.extract_strided_slice %8 {offsets = [8, 0], sizes = [2, 64], strides = [1, 1]} : vector<16x64xf32> to vector<2x64xf32>
    %cst_28 = arith.constant dense<0.000000e+00> : vector<2x64xf32>
    %159 = tpu.matmul %138, %0, %cst_28 {dimension_numbers = #tpu.dot_dimension_numbers<[1], [0], [0], [1], [0, 0, 1, 1], [], []>} : vector<2x16xf32>, vector<16x64xf32>, vector<2x64xf32> -> vector<2x64xf32>
    %160 = arith.addf %158, %159 : vector<2x64xf32>
    %161 = arith.negf %160 : vector<2x64xf32>
    %162 = math.exp %161 : vector<2x64xf32>
    %cst_29 = arith.constant 1.000000e+00 : f32
    %163 = vector.broadcast %cst_29 : f32 to vector<2x64xf32>
    %164 = arith.addf %163, %162 : vector<2x64xf32>
    %165 = arith.divf %163, %164 : vector<2x64xf32>
    %166 = math.tanh %160 : vector<2x64xf32>
    %167 = vector.extract_strided_slice %165 {offsets = [0, 0], sizes = [2, 16], strides = [1, 1]} : vector<2x64xf32> to vector<2x16xf32>
    %168 = vector.extract_strided_slice %165 {offsets = [0, 16], sizes = [2, 16], strides = [1, 1]} : vector<2x64xf32> to vector<2x16xf32>
    %169 = vector.extract_strided_slice %166 {offsets = [0, 32], sizes = [2, 16], strides = [1, 1]} : vector<2x64xf32> to vector<2x16xf32>
    %170 = vector.extract_strided_slice %165 {offsets = [0, 48], sizes = [2, 16], strides = [1, 1]} : vector<2x64xf32> to vector<2x16xf32>
    %171 = arith.mulf %168, %136 : vector<2x16xf32>
    %172 = arith.mulf %167, %169 : vector<2x16xf32>
    %173 = arith.addf %171, %172 : vector<2x16xf32>
    %174 = math.tanh %173 : vector<2x16xf32>
    %175 = arith.mulf %170, %174 : vector<2x16xf32>
    %176 = tpu.concatenate %175, %157 in 1 : vector<2x16xf32>, vector<2x16xf32> -> vector<2x32xf32>
    %cst_30 = arith.constant dense<0.000000e+00> : vector<2x64xf32>
    %177 = tpu.matmul %176, %1, %cst_30 {dimension_numbers = #tpu.dot_dimension_numbers<[1], [0], [0], [1], [0, 0, 1, 1], [], []>} : vector<2x32xf32>, vector<32x64xf32>, vector<2x64xf32> -> vector<2x64xf32>
    %178 = vector.broadcast %2 : vector<1x64xf32> to vector<2x64xf32>
    %179 = arith.addf %177, %178 : vector<2x64xf32>
    %180 = arith.negf %179 : vector<2x64xf32>
    %181 = math.exp %180 : vector<2x64xf32>
    %cst_31 = arith.constant 1.000000e+00 : f32
    %182 = vector.broadcast %cst_31 : f32 to vector<2x64xf32>
    %183 = arith.addf %182, %181 : vector<2x64xf32>
    %184 = arith.divf %182, %183 : vector<2x64xf32>
    %185 = math.tanh %179 : vector<2x64xf32>
    %186 = vector.extract_strided_slice %184 {offsets = [0, 0], sizes = [2, 16], strides = [1, 1]} : vector<2x64xf32> to vector<2x16xf32>
    %187 = vector.extract_strided_slice %184 {offsets = [0, 16], sizes = [2, 16], strides = [1, 1]} : vector<2x64xf32> to vector<2x16xf32>
    %188 = vector.extract_strided_slice %185 {offsets = [0, 32], sizes = [2, 16], strides = [1, 1]} : vector<2x64xf32> to vector<2x16xf32>
    %189 = vector.extract_strided_slice %184 {offsets = [0, 48], sizes = [2, 16], strides = [1, 1]} : vector<2x64xf32> to vector<2x16xf32>
    %190 = arith.mulf %187, %155 : vector<2x16xf32>
    %191 = arith.mulf %186, %188 : vector<2x16xf32>
    %192 = arith.addf %190, %191 : vector<2x16xf32>
    %193 = math.tanh %192 : vector<2x16xf32>
    %194 = arith.mulf %189, %193 : vector<2x16xf32>
    %195 = vector.extract_strided_slice %8 {offsets = [10, 0], sizes = [2, 64], strides = [1, 1]} : vector<16x64xf32> to vector<2x64xf32>
    %cst_32 = arith.constant dense<0.000000e+00> : vector<2x64xf32>
    %196 = tpu.matmul %175, %0, %cst_32 {dimension_numbers = #tpu.dot_dimension_numbers<[1], [0], [0], [1], [0, 0, 1, 1], [], []>} : vector<2x16xf32>, vector<16x64xf32>, vector<2x64xf32> -> vector<2x64xf32>
    %197 = arith.addf %195, %196 : vector<2x64xf32>
    %198 = arith.negf %197 : vector<2x64xf32>
    %199 = math.exp %198 : vector<2x64xf32>
    %cst_33 = arith.constant 1.000000e+00 : f32
    %200 = vector.broadcast %cst_33 : f32 to vector<2x64xf32>
    %201 = arith.addf %200, %199 : vector<2x64xf32>
    %202 = arith.divf %200, %201 : vector<2x64xf32>
    %203 = math.tanh %197 : vector<2x64xf32>
    %204 = vector.extract_strided_slice %202 {offsets = [0, 0], sizes = [2, 16], strides = [1, 1]} : vector<2x64xf32> to vector<2x16xf32>
    %205 = vector.extract_strided_slice %202 {offsets = [0, 16], sizes = [2, 16], strides = [1, 1]} : vector<2x64xf32> to vector<2x16xf32>
    %206 = vector.extract_strided_slice %203 {offsets = [0, 32], sizes = [2, 16], strides = [1, 1]} : vector<2x64xf32> to vector<2x16xf32>
    %207 = vector.extract_strided_slice %202 {offsets = [0, 48], sizes = [2, 16], strides = [1, 1]} : vector<2x64xf32> to vector<2x16xf32>
    %208 = arith.mulf %205, %173 : vector<2x16xf32>
    %209 = arith.mulf %204, %206 : vector<2x16xf32>
    %210 = arith.addf %208, %209 : vector<2x16xf32>
    %211 = math.tanh %210 : vector<2x16xf32>
    %212 = arith.mulf %207, %211 : vector<2x16xf32>
    %213 = tpu.concatenate %212, %194 in 1 : vector<2x16xf32>, vector<2x16xf32> -> vector<2x32xf32>
    %cst_34 = arith.constant dense<0.000000e+00> : vector<2x64xf32>
    %214 = tpu.matmul %213, %1, %cst_34 {dimension_numbers = #tpu.dot_dimension_numbers<[1], [0], [0], [1], [0, 0, 1, 1], [], []>} : vector<2x32xf32>, vector<32x64xf32>, vector<2x64xf32> -> vector<2x64xf32>
    %215 = vector.broadcast %2 : vector<1x64xf32> to vector<2x64xf32>
    %216 = arith.addf %214, %215 : vector<2x64xf32>
    %217 = arith.negf %216 : vector<2x64xf32>
    %218 = math.exp %217 : vector<2x64xf32>
    %cst_35 = arith.constant 1.000000e+00 : f32
    %219 = vector.broadcast %cst_35 : f32 to vector<2x64xf32>
    %220 = arith.addf %219, %218 : vector<2x64xf32>
    %221 = arith.divf %219, %220 : vector<2x64xf32>
    %222 = math.tanh %216 : vector<2x64xf32>
    %223 = vector.extract_strided_slice %221 {offsets = [0, 0], sizes = [2, 16], strides = [1, 1]} : vector<2x64xf32> to vector<2x16xf32>
    %224 = vector.extract_strided_slice %221 {offsets = [0, 16], sizes = [2, 16], strides = [1, 1]} : vector<2x64xf32> to vector<2x16xf32>
    %225 = vector.extract_strided_slice %222 {offsets = [0, 32], sizes = [2, 16], strides = [1, 1]} : vector<2x64xf32> to vector<2x16xf32>
    %226 = vector.extract_strided_slice %221 {offsets = [0, 48], sizes = [2, 16], strides = [1, 1]} : vector<2x64xf32> to vector<2x16xf32>
    %227 = arith.mulf %224, %192 : vector<2x16xf32>
    %228 = arith.mulf %223, %225 : vector<2x16xf32>
    %229 = arith.addf %227, %228 : vector<2x16xf32>
    %230 = math.tanh %229 : vector<2x16xf32>
    %231 = arith.mulf %226, %230 : vector<2x16xf32>
    %232 = vector.extract_strided_slice %8 {offsets = [12, 0], sizes = [2, 64], strides = [1, 1]} : vector<16x64xf32> to vector<2x64xf32>
    %cst_36 = arith.constant dense<0.000000e+00> : vector<2x64xf32>
    %233 = tpu.matmul %212, %0, %cst_36 {dimension_numbers = #tpu.dot_dimension_numbers<[1], [0], [0], [1], [0, 0, 1, 1], [], []>} : vector<2x16xf32>, vector<16x64xf32>, vector<2x64xf32> -> vector<2x64xf32>
    %234 = arith.addf %232, %233 : vector<2x64xf32>
    %235 = arith.negf %234 : vector<2x64xf32>
    %236 = math.exp %235 : vector<2x64xf32>
    %cst_37 = arith.constant 1.000000e+00 : f32
    %237 = vector.broadcast %cst_37 : f32 to vector<2x64xf32>
    %238 = arith.addf %237, %236 : vector<2x64xf32>
    %239 = arith.divf %237, %238 : vector<2x64xf32>
    %240 = math.tanh %234 : vector<2x64xf32>
    %241 = vector.extract_strided_slice %239 {offsets = [0, 0], sizes = [2, 16], strides = [1, 1]} : vector<2x64xf32> to vector<2x16xf32>
    %242 = vector.extract_strided_slice %239 {offsets = [0, 16], sizes = [2, 16], strides = [1, 1]} : vector<2x64xf32> to vector<2x16xf32>
    %243 = vector.extract_strided_slice %240 {offsets = [0, 32], sizes = [2, 16], strides = [1, 1]} : vector<2x64xf32> to vector<2x16xf32>
    %244 = vector.extract_strided_slice %239 {offsets = [0, 48], sizes = [2, 16], strides = [1, 1]} : vector<2x64xf32> to vector<2x16xf32>
    %245 = arith.mulf %242, %210 : vector<2x16xf32>
    %246 = arith.mulf %241, %243 : vector<2x16xf32>
    %247 = arith.addf %245, %246 : vector<2x16xf32>
    %248 = math.tanh %247 : vector<2x16xf32>
    %249 = arith.mulf %244, %248 : vector<2x16xf32>
    %250 = tpu.concatenate %249, %231 in 1 : vector<2x16xf32>, vector<2x16xf32> -> vector<2x32xf32>
    %cst_38 = arith.constant dense<0.000000e+00> : vector<2x64xf32>
    %251 = tpu.matmul %250, %1, %cst_38 {dimension_numbers = #tpu.dot_dimension_numbers<[1], [0], [0], [1], [0, 0, 1, 1], [], []>} : vector<2x32xf32>, vector<32x64xf32>, vector<2x64xf32> -> vector<2x64xf32>
    %252 = vector.broadcast %2 : vector<1x64xf32> to vector<2x64xf32>
    %253 = arith.addf %251, %252 : vector<2x64xf32>
    %254 = arith.negf %253 : vector<2x64xf32>
    %255 = math.exp %254 : vector<2x64xf32>
    %cst_39 = arith.constant 1.000000e+00 : f32
    %256 = vector.broadcast %cst_39 : f32 to vector<2x64xf32>
    %257 = arith.addf %256, %255 : vector<2x64xf32>
    %258 = arith.divf %256, %257 : vector<2x64xf32>
    %259 = math.tanh %253 : vector<2x64xf32>
    %260 = vector.extract_strided_slice %258 {offsets = [0, 0], sizes = [2, 16], strides = [1, 1]} : vector<2x64xf32> to vector<2x16xf32>
    %261 = vector.extract_strided_slice %258 {offsets = [0, 16], sizes = [2, 16], strides = [1, 1]} : vector<2x64xf32> to vector<2x16xf32>
    %262 = vector.extract_strided_slice %259 {offsets = [0, 32], sizes = [2, 16], strides = [1, 1]} : vector<2x64xf32> to vector<2x16xf32>
    %263 = vector.extract_strided_slice %258 {offsets = [0, 48], sizes = [2, 16], strides = [1, 1]} : vector<2x64xf32> to vector<2x16xf32>
    %264 = arith.mulf %261, %229 : vector<2x16xf32>
    %265 = arith.mulf %260, %262 : vector<2x16xf32>
    %266 = arith.addf %264, %265 : vector<2x16xf32>
    %267 = math.tanh %266 : vector<2x16xf32>
    %268 = arith.mulf %263, %267 : vector<2x16xf32>
    %269 = vector.extract_strided_slice %8 {offsets = [14, 0], sizes = [2, 64], strides = [1, 1]} : vector<16x64xf32> to vector<2x64xf32>
    %cst_40 = arith.constant dense<0.000000e+00> : vector<2x64xf32>
    %270 = tpu.matmul %249, %0, %cst_40 {dimension_numbers = #tpu.dot_dimension_numbers<[1], [0], [0], [1], [0, 0, 1, 1], [], []>} : vector<2x16xf32>, vector<16x64xf32>, vector<2x64xf32> -> vector<2x64xf32>
    %271 = arith.addf %269, %270 : vector<2x64xf32>
    %272 = arith.negf %271 : vector<2x64xf32>
    %273 = math.exp %272 : vector<2x64xf32>
    %cst_41 = arith.constant 1.000000e+00 : f32
    %274 = vector.broadcast %cst_41 : f32 to vector<2x64xf32>
    %275 = arith.addf %274, %273 : vector<2x64xf32>
    %276 = arith.divf %274, %275 : vector<2x64xf32>
    %277 = math.tanh %271 : vector<2x64xf32>
    %278 = vector.extract_strided_slice %276 {offsets = [0, 0], sizes = [2, 16], strides = [1, 1]} : vector<2x64xf32> to vector<2x16xf32>
    %279 = vector.extract_strided_slice %276 {offsets = [0, 16], sizes = [2, 16], strides = [1, 1]} : vector<2x64xf32> to vector<2x16xf32>
    %280 = vector.extract_strided_slice %277 {offsets = [0, 32], sizes = [2, 16], strides = [1, 1]} : vector<2x64xf32> to vector<2x16xf32>
    %281 = vector.extract_strided_slice %276 {offsets = [0, 48], sizes = [2, 16], strides = [1, 1]} : vector<2x64xf32> to vector<2x16xf32>
    %282 = arith.mulf %279, %247 : vector<2x16xf32>
    %283 = arith.mulf %278, %280 : vector<2x16xf32>
    %284 = arith.addf %282, %283 : vector<2x16xf32>
    %285 = math.tanh %284 : vector<2x16xf32>
    %286 = arith.mulf %281, %285 : vector<2x16xf32>
    %287 = tpu.concatenate %286, %268 in 1 : vector<2x16xf32>, vector<2x16xf32> -> vector<2x32xf32>
    %cst_42 = arith.constant dense<0.000000e+00> : vector<2x64xf32>
    %288 = tpu.matmul %287, %1, %cst_42 {dimension_numbers = #tpu.dot_dimension_numbers<[1], [0], [0], [1], [0, 0, 1, 1], [], []>} : vector<2x32xf32>, vector<32x64xf32>, vector<2x64xf32> -> vector<2x64xf32>
    %289 = vector.broadcast %2 : vector<1x64xf32> to vector<2x64xf32>
    %290 = arith.addf %288, %289 : vector<2x64xf32>
    %291 = arith.negf %290 : vector<2x64xf32>
    %292 = math.exp %291 : vector<2x64xf32>
    %cst_43 = arith.constant 1.000000e+00 : f32
    %293 = vector.broadcast %cst_43 : f32 to vector<2x64xf32>
    %294 = arith.addf %293, %292 : vector<2x64xf32>
    %295 = arith.divf %293, %294 : vector<2x64xf32>
    %296 = math.tanh %290 : vector<2x64xf32>
    %297 = vector.extract_strided_slice %295 {offsets = [0, 0], sizes = [2, 16], strides = [1, 1]} : vector<2x64xf32> to vector<2x16xf32>
    %298 = vector.extract_strided_slice %295 {offsets = [0, 16], sizes = [2, 16], strides = [1, 1]} : vector<2x64xf32> to vector<2x16xf32>
    %299 = vector.extract_strided_slice %296 {offsets = [0, 32], sizes = [2, 16], strides = [1, 1]} : vector<2x64xf32> to vector<2x16xf32>
    %300 = vector.extract_strided_slice %295 {offsets = [0, 48], sizes = [2, 16], strides = [1, 1]} : vector<2x64xf32> to vector<2x16xf32>
    %301 = arith.mulf %298, %266 : vector<2x16xf32>
    %302 = arith.mulf %297, %299 : vector<2x16xf32>
    %303 = arith.addf %301, %302 : vector<2x16xf32>
    %304 = math.tanh %303 : vector<2x16xf32>
    %305 = arith.mulf %300, %304 : vector<2x16xf32>
    %cst_44 = arith.constant dense<0xFF800000> : vector<2xf32>
    %306 = vector.multi_reduction <maximumf>, %305, %cst_44 [1] : vector<2x16xf32> to vector<2xf32>
    %307 = vector.shape_cast %306 : vector<2xf32> to vector<2x1xf32>
    %308 = vector.broadcast %307 : vector<2x1xf32> to vector<2x16xf32>
    %309 = arith.subf %305, %308 : vector<2x16xf32>
    %310 = math.exp %309 : vector<2x16xf32>
    %cst_45 = arith.constant dense<0.000000e+00> : vector<2xf32>
    %311 = vector.multi_reduction <add>, %310, %cst_45 [1] : vector<2x16xf32> to vector<2xf32>
    %312 = vector.shape_cast %311 : vector<2xf32> to vector<2x1xf32>
    %313 = tpu.reciprocal %312 : vector<2x1xf32> -> vector<2x1xf32>
    %314 = vector.broadcast %313 : vector<2x1xf32> to vector<2x16xf32>
    %315 = arith.mulf %310, %314 : vector<2x16xf32>
    %c0_46 = arith.constant 0 : index
    %c0_47 = arith.constant 0 : index
    %316 = vector.load %arg6[%c0_46, %c0_47] : memref<2x16xf32, #tpu.memory_space<vmem>>, vector<2x16xf32>
    tpu.vector_store %arg6[%c0_46, %c0_47], %315 {strides = array<i32>} : memref<2x16xf32, #tpu.memory_space<vmem>>, vector<2x16xf32>,
    return
  }
}

</mosaic_0001>

<bundles_post_ra>
// kernel: rnn_forward.1
= control target key start
LH: loop header
LB: loop body
LE: loop exit
PB: predicated region body
PF: predicated region fallthrough
CT: control target
= control target key end

     0   :  { %vm49_vm0 = vcmask 1042432   ;;  %v2275_v3 = vmov 0.0   ;;  %vm42_vm1 = vcmask 89088   ;;  %s2664_s0 = inlined_call_operand.vmem [shape: f32[16,11], index: 0, kind: input, shape index: {}]   ;;  %s2665_s1 = inlined_call_operand.vmem [shape: f32[11,64], index: 1, kind: input, shape index: {}]   ;;  %s2666_s2 = inlined_call_operand.vmem [shape: f32[16,64], index: 2, kind: input, shape index: {}]   ;;  %s2667_s3 = inlined_call_operand.vmem [shape: f32[1,64], index: 3, kind: input, shape index: {}]   ;;  %s2668_s4 = inlined_call_operand.vmem [shape: f32[32,64], index: 4, kind: input, shape index: {}]   ;;  %s2669_s5 = inlined_call_operand.vmem [shape: f32[1,64], index: 5, kind: input, shape index: {}]   ;;  %s2670_s6 = inlined_call_operand.hbm [shape: f32[2,16], index: 6, kind: output, shape index: {}]  }
   0x1   :  { %v34_v0 = vld [vmem:[%s2665_s1 + $0x8] sm:$0x7]  ;;  %v33_v1 = vld [vmem:[%s2665_s1] sm:$0xff]  ;;  %1970 = vmatprep.subr.mxu1 %v2275_v3 }
   0x2   :  { %v31_v2 = vld [vmem:[%s2664_s0] sm:$0xff]  ;;  %1963 = vmatprep.subr.msk.mxu0 %vm49_vm0, %v34_v0  ;;  %v2330_v4 = vld [vmem:[%s2666_s2 + $0x8] sm:$0xff] }
   0x3   :  { %1964 = vmatpush3.msk.msra.mxu0 %vm49_vm0, %v34_v0  ;;  %1967 = vmatprep.mubr.msk.f32.mxu0 %vm42_vm1, %v31_v2  ;;  %v32_v5 = vld [vmem:[%s2664_s0 + $0x8] sm:$0xff]  ;;  %v2338_v6 = vld [vmem:[%s2666_s2] sm:$0xff] }
   0x4   :  { %11 = vsyncpa [#allocation3], 0  ;;  %1965 = vmatprep.subr.mxu0 %v33_v1  ;;  %1971 = vmatpush3.msra.mxu1 %v2330_v4  ;;  %vm2276_vm2 = vmmov 0   ;;  %v1859_v7 = vld [vmem:[%s2667_s3] ss:$0 sm:$0xff]  ;;  %s2277_s8 = smov 96  }
   0x5   :  { %1966 = vmatpush3.msra.mxu0 %v33_v1  ;;  %1972 = vmatprep.subr.mxu1 %v2275_v3  ;;  %s2278_s3 = smov 16   ;;  %v2372_v25 = vld [vmem:[%s2668_s4 + $0x18] sm:$0xff]  ;;  %v2377_v26 = vld [vmem:[%s2668_s4 + $0x10] sm:$0xff]  ;;  %v2384_v27 = vld [vmem:[%s2668_s4 + $0x8] sm:$0xff]  ;;  %s2279_s15 = smov 32   ;;  %vm128_vm3 = vcmask 130048  }
   0x6   :  { %1968 = vmatmul.mubr.msk.f32.vlgmr.msra.gmra.mxu0 %vm42_vm1, %v32_v5  ;;  %1973 = vmatpush3.msra.mxu1 %v2338_v6  ;;  %v2394_v29 = vld [vmem:[%s2668_s4] sm:$0xff]  ;;  %s2280_s18 = smov 80   ;;  %vm238_vm4 = vcmask 261120   ;;  %vm1823_vm5 = vcmask 517504   ;;  %vm1834_vm6 = vcmask 123904  }
   0x7   :  { %1974 = vmatprep.mubr.msk.f32.mxu1 %vm2276_vm2, %v2275_v3  ;;  %1977 = vmatprep.subr.mxu0 %v2275_v3  ;;  %v2421_v34 = vld [vmem:[%s2669_s5] ss:$0 sm:$0xff]  ;;  %s2281_s5 = smov [#allocation2]  }
   0x8   :  { %1975 = vmatmul.mubr.f32.vlgmr.msra.gmra.mxu1 %v2275_v3  ;;  %1988 = vmatprep.subr.mxu1 %v2275_v3  ;;  %s1851_s20 = sshll.u32 %s2281_s5, 4  ;;  %s1852_s20 = int_to_ptr.vmem [resolvable:$true] %s1851_s20 }
   0x9   :  { %1989 = vmatpush3.msra.mxu1 %v2330_v4  ;;  %1992 = vmatprep.mubr.msk.f32.mxu1 %vm2276_vm2, %v2275_v3  ;;  %s2253_s21 = scalar_lea.vmem %s1852_s20, 32  ;;  %p2258_p1 = scmp.lt.s32.totalorder %s1852_s20, %s1852_s20 }
   0xa   :  { %1990 = vmatprep.subr.mxu1 %v2275_v3  ;;  %1985 = vmatprep.mubr.msk.f32.mxu0 %vm2276_vm2, %v2275_v3  ;;  %p2254_p0 = scmp.ne.s32.totalorder %s1852_s20, %s2253_s21  ;;  %p2259_p2 = scmp.lt.s32.totalorder %s2253_s21, %s2253_s21 }
   0xb   :  { %1991 = vmatpush3.msra.mxu1 %v2338_v6  ;;  %1978 = vmatpush3.msra.mxu0 %v2372_v25 }
   0xc   :  { %1995 = vmatprep.subr.mxu1 %v2275_v3  ;;  %1979 = vmatprep.subr.mxu0 %v2275_v3  ;;  %p2260_p3 = por %p2259_p2, %p2258_p1 }
   0xd   :  { %1980 = vmatpush3.msra.mxu0 %v2377_v26 }
   0xe   :  { %1981 = vmatprep.subr.mxu0 %v2275_v3  ;;  %p2261_p4 = pnand %p2260_p3, %p2254_p0 }
   0xf   :  { %1982 = vmatpush3.msra.mxu0 %v2384_v27 }
  0x10   :  { %1983 = vmatprep.subr.mxu0 %v2275_v3 }
  0x11   :  { %1984 = vmatpush3.msra.mxu0 %v2394_v29 }
  0x12   :  { %2006 = vmatprep.subr.mxu0 %v2275_v3 }
  0xc6   :  { %v1969_v8 = vpop.f32.mrf.mxu0 }
  0xc7   :  { %v2359_v9 = vadd.f32 %v1969_v8, %v1859_v7 }
  0xc8   :  { %v119_v10 = vpop.f32.mrf.mxu0  ;;  %v198_v11 = vpop.f32.mrf.mxu1 }
  0xc9   :  { %v2361_v12 = vadd.f32 %v1859_v7, %v119_v10 }
  0xca   :  { %v1976_v13 = vpop.f32.mrf.mxu1 }
  0xcb   :  { %v202_v14 = vadd.f32 %v198_v11, %v2361_v12 }
  0xcd   :  { %2121 = vtanh.f32 %v202_v14  ;;  %v1863_v16 = vmul.f32 -1.442695, %v202_v14 }
  0xcf   :  { %2123 = vpow2.f32 %v1863_v16 }
  0xda   :  { %v2122_v15 = vpop.eup %2121 }
  0xdb   :  { %212 = vrot.lane.b32.xlu0 %v2122_v15, %s2277_s8 }
  0xdc   :  { %v2124_v17 = vpop.eup %2123 }
  0xdd   :  { %v206_v18 = vadd.f32 1.0, %v2124_v17 }
  0xdf   :  { %2125 = vrcp.f32 %v206_v18 }
  0xec   :  { %v2126_v19 = vpop.eup %2125 }
  0xed   :  { %v210_v22 = vmul.f32 0.0, %v2126_v19 }
 0x14d   :  { %v213_v20 = vpop.permute.xlu0 %212 }
 0x14e   :  { %v215_v21 = vmul.f32 %v2126_v19, %v213_v20 }
 0x150   :  { %217 = vrot.lane.b32.xlu0 %v215_v21, %s2278_s3 }
 0x1c2   :  { %v218_v23 = vpop.permute.xlu0 %217 }
 0x1c3   :  { %v2366_v24 = vadd.f32 %v218_v23, %v210_v22 }
 0x1c5   :  { %2127 = vtanh.f32 %v2366_v24  ;;  %v420_v56 = vrot.slane %v2366_v24, 6 }
 0x1d2   :  { %v2128_v28 = vpop.eup %2127 }
 0x1d3   :  { %223 = vrot.lane.b32.xlu1 %v2128_v28, %s2279_s15 }
 0x245   :  { %v224_v30 = vpop.permute.xlu1 %223 }
 0x246   :  { %v226_v31 = vmul.f32 %v2126_v19, %v224_v30 }
 0x248   :  { %228 = vrot.lane.b32.xlu1 %v226_v31, %s2280_s18 }
 0x2ba   :  { %v229_v32 = vpop.permute.xlu1 %228 }
 0x2bb   :  { %v231_v33 = vsel %vm128_vm3, %v229_v32, 0.0  ;;  %1993 = vmatmul.mubr.msk.f32.vlgmr.msra.gmra.mxu1 %vm128_vm3, %v229_v32 }
 0x2bc   :  { %1986 = vmatmul.mubr.msk.f32.vlgmr.msra.gmra.mxu0 %vm238_vm4, %v231_v33  ;;  %1996 = vmatpush3.msra.mxu1 %v2372_v25 }
 0x2bd   :  { %1997 = vmatprep.subr.mxu1 %v2275_v3  ;;  %2007 = vmatpush3.msra.mxu0 %v2330_v4 }
 0x2be   :  { %1998 = vmatpush3.msra.mxu1 %v2377_v26  ;;  %2008 = vmatprep.subr.mxu0 %v2275_v3 }
 0x2bf   :  { %1999 = vmatprep.subr.mxu1 %v2275_v3  ;;  %2009 = vmatpush3.msra.mxu0 %v2338_v6 }
 0x2c0   :  { %2000 = vmatpush3.msra.mxu1 %v2384_v27  ;;  %2003 = vmatprep.mubr.msk.f32.mxu1 %vm2276_vm2, %v2275_v3 }
 0x2c1   :  { %2001 = vmatprep.subr.mxu1 %v2275_v3  ;;  %2010 = vmatprep.mubr.msk.f32.mxu0 %vm2276_vm2, %v2275_v3 }
 0x2c2   :  { %2002 = vmatpush3.msra.mxu1 %v2394_v29  ;;  %2013 = vmatprep.subr.mxu0 %v2275_v3 }
 0x2c3   :  { %2024 = vmatprep.subr.mxu1 %v2275_v3 }
 0x37b   :  { %v404_v35 = vpop.f32.mrf.mxu1 }
 0x37c   :  { %v409_v36 = vrot.slane %v404_v35, 6  ;;  %v308_v37 = vpop.f32.mrf.mxu0 }
 0x37d   :  { %v309_v38 = vadd.f32 %v2421_v34, %v308_v37  ;;  %v1994_v39 = vpop.f32.mrf.mxu1 }
 0x37e   :  { %v411_v40 = vadd.f32 %v409_v36, %v2361_v12  ;;  %v1987_v41 = vpop.f32.mrf.mxu0 }
 0x37f   :  { %2129 = vtanh.f32 %v309_v38  ;;  %v1866_v44 = vmul.f32 -1.442695, %v309_v38 }
 0x380   :  { %2131 = vtanh.f32 %v411_v40  ;;  %v1868_v45 = vmul.f32 -1.442695, %v411_v40 }
 0x381   :  { %2133 = vpow2.f32 %v1866_v44 }
 0x382   :  { %2135 = vpow2.f32 %v1868_v45 }
 0x38c   :  { %v2130_v42 = vpop.eup %2129 }
 0x38d   :  { %v2132_v43 = vpop.eup %2131  ;;  %321 = vrot.lane.b32.xlu0 %v2130_v42, %s2277_s8 }
 0x38e   :  { %424 = vrot.lane.b32.xlu1 %v2132_v43, %s2277_s8  ;;  %v2134_v46 = vpop.eup %2133 }
 0x38f   :  { %v2136_v47 = vpop.eup %2135  ;;  %v315_v48 = vadd.f32 1.0, %v2134_v46 }
 0x390   :  { %v415_v49 = vadd.f32 1.0, %v2136_v47 }
 0x391   :  { %2137 = vrcp.f32 %v315_v48 }
 0x392   :  { %2139 = vrcp.f32 %v415_v49 }
 0x39e   :  { %v2138_v50 = vpop.eup %2137 }
 0x39f   :  { %v2140_v52 = vpop.eup %2139  ;;  %v319_v57 = vmul.f32 0.0, %v2138_v50 }
 0x3a0   :  { %v422_v59 = vmul.f32 %v2140_v52, %v420_v56 }
 0x3ff   :  { %v322_v51 = vpop.permute.xlu0 %321 }
 0x400   :  { %v324_v53 = vmul.f32 %v2138_v50, %v322_v51  ;;  %v425_v54 = vpop.permute.xlu1 %424 }
 0x401   :  { %v427_v55 = vmul.f32 %v2140_v52, %v425_v54 }
 0x402   :  { %326 = vrot.lane.b32.xlu0 %v324_v53, %s2278_s3 }
 0x403   :  { %429 = vrot.lane.b32.xlu1 %v427_v55, %s2278_s3 }
 0x474   :  { %v327_v58 = vpop.permute.xlu0 %326 }
 0x475   :  { %v2430_v60 = vadd.f32 %v327_v58, %v319_v57  ;;  %v430_v61 = vpop.permute.xlu1 %429 }
 0x476   :  { %v2432_v62 = vadd.f32 %v430_v61, %v422_v59 }
 0x477   :  { %2141 = vtanh.f32 %v2430_v60 }
 0x478   :  { %2143 = vtanh.f32 %v2432_v62  ;;  %v634_v44 = vrot.slane %v2432_v62, 6 }
 0x484   :  { %v2142_v63 = vpop.eup %2141 }
 0x485   :  { %v2144_v0 = vpop.eup %2143  ;;  %332 = vrot.lane.b32.xlu0 %v2142_v63, %s2279_s15 }
 0x486   :  { %435 = vrot.lane.b32.xlu1 %v2144_v0, %s2279_s15 }
 0x4f7   :  { %v333_v1 = vpop.permute.xlu0 %332 }
 0x4f8   :  { %v335_v2 = vmul.f32 %v2138_v50, %v333_v1  ;;  %v436_v5 = vpop.permute.xlu1 %435 }
 0x4f9   :  { %v438_v7 = vmul.f32 %v2140_v52, %v436_v5 }
 0x4fa   :  { %v444_v8 = vrot.slane %v335_v2, 6 }
 0x4fb   :  { %440 = vrot.lane.b32.xlu0 %v438_v7, %s2280_s18  ;;  %v547_v10 = vrot.slane %v438_v7, 2 }
 0x4fc   :  { %445 = vrot.lane.b32.xlu1 %v444_v8, %s2277_s8 }
 0x4ff   :  { %548 = vrot.lane.b32.xlu0 %v547_v10, %s2280_s18 }
 0x56d   :  { %v441_v11 = vpop.permute.xlu0 %440 }
 0x56e   :  { %v446_v13 = vpop.permute.xlu1 %445 }
 0x56f   :  { %v448_v14 = vsel %vm128_vm3, %v441_v11, %v446_v13 }
 0x570   :  { %v450_v15 = vrot.slane %v448_v14, 2 }
 0x571   :  { %v549_v16 = vpop.permute.xlu0 %548 }
 0x572   :  { %2004 = vmatmul.mubr.msk.f32.vlgmr.msra.gmra.mxu1 %vm238_vm4, %v450_v15  ;;  %2011 = vmatmul.mubr.msk.f32.vlgmr.msra.gmra.mxu0 %vm128_vm3, %v549_v16 }
 0x573   :  { %2014 = vmatpush3.msra.mxu0 %v2372_v25  ;;  %2025 = vmatpush3.msra.mxu1 %v2330_v4 }
 0x574   :  { %2015 = vmatprep.subr.mxu0 %v2275_v3  ;;  %2026 = vmatprep.subr.mxu1 %v2275_v3 }
 0x575   :  { %2016 = vmatpush3.msra.mxu0 %v2377_v26  ;;  %2021 = vmatprep.mubr.msk.f32.mxu0 %vm2276_vm2, %v2275_v3 }
 0x576   :  { %2017 = vmatprep.subr.mxu0 %v2275_v3  ;;  %2027 = vmatpush3.msra.mxu1 %v2338_v6 }
 0x577   :  { %2018 = vmatpush3.msra.mxu0 %v2384_v27  ;;  %2028 = vmatprep.mubr.msk.f32.mxu1 %vm2276_vm2, %v2275_v3 }
 0x578   :  { %2019 = vmatprep.subr.mxu0 %v2275_v3  ;;  %2031 = vmatprep.subr.mxu1 %v2275_v3 }
 0x579   :  { %2020 = vmatpush3.msra.mxu0 %v2394_v29 }
 0x57a   :  { %2042 = vmatprep.subr.mxu0 %v2275_v3 }
 0x632   :  { %v519_v17 = vpop.f32.mrf.mxu1  ;;  %v618_v18 = vpop.f32.mrf.mxu0 }
 0x633   :  { %v520_v19 = vadd.f32 %v2421_v34, %v519_v17  ;;  %v623_v20 = vrot.slane %v618_v18, 4 }
 0x634   :  { %v2005_v21 = vpop.f32.mrf.mxu1  ;;  %v2012_v22 = vpop.f32.mrf.mxu0 }
 0x635   :  { %2145 = vtanh.f32 %v520_v19  ;;  %v625_v23 = vadd.f32 %v623_v20, %v2361_v12  ;;  %v1870_v30 = vmul.f32 -1.442695, %v520_v19 }
 0x637   :  { %2147 = vtanh.f32 %v625_v23  ;;  %v1872_v31 = vmul.f32 -1.442695, %v625_v23 }
 0x638   :  { %2149 = vpow2.f32 %v1870_v30 }
 0x639   :  { %2151 = vpow2.f32 %v1872_v31 }
 0x642   :  { %v2146_v24 = vpop.eup %2145 }
 0x643   :  { %532 = vrot.lane.b32.xlu1 %v2146_v24, %s2277_s8 }
 0x644   :  { %v2148_v28 = vpop.eup %2147 }
 0x645   :  { %638 = vrot.lane.b32.xlu0 %v2148_v28, %s2277_s8  ;;  %v2150_v32 = vpop.eup %2149 }
 0x646   :  { %v2152_v33 = vpop.eup %2151  ;;  %v526_v35 = vadd.f32 1.0, %v2150_v32 }
 0x647   :  { %v629_v36 = vadd.f32 1.0, %v2152_v33 }
 0x648   :  { %2153 = vrcp.f32 %v526_v35 }
 0x649   :  { %2155 = vrcp.f32 %v629_v36 }
 0x655   :  { %v2154_v37 = vpop.eup %2153 }
 0x656   :  { %v2156_v40 = vpop.eup %2155  ;;  %v530_v43 = vmul.f32 %v2154_v37, %v2430_v60 }
 0x657   :  { %v636_v47 = vmul.f32 %v2156_v40, %v634_v44 }
 0x6b5   :  { %v533_v38 = vpop.permute.xlu1 %532 }
 0x6b6   :  { %v535_v39 = vmul.f32 %v2154_v37, %v533_v38 }
 0x6b7   :  { %v639_v41 = vpop.permute.xlu0 %638 }
 0x6b8   :  { %537 = vrot.lane.b32.xlu1 %v535_v39, %s2278_s3  ;;  %v641_v42 = vmul.f32 %v2156_v40, %v639_v41 }
 0x6ba   :  { %643 = vrot.lane.b32.xlu0 %v641_v42, %s2278_s3 }
 0x72a   :  { %v538_v45 = vpop.permute.xlu1 %537 }
 0x72b   :  { %v2468_v46 = vadd.f32 %v538_v45, %v530_v43 }
 0x72c   :  { %v644_v48 = vpop.permute.xlu0 %643 }
 0x72d   :  { %2157 = vtanh.f32 %v2468_v46  ;;  %v2471_v49 = vadd.f32 %v644_v48, %v636_v47 }
 0x72f   :  { %2159 = vtanh.f32 %v2471_v49  ;;  %v848_v28 = vrot.slane %v2471_v49, 6 }
 0x73a   :  { %v2158_v50 = vpop.eup %2157 }
 0x73b   :  { %543 = vrot.lane.b32.xlu1 %v2158_v50, %s2279_s15 }
 0x73c   :  { %v2160_v51 = vpop.eup %2159 }
 0x73d   :  { %649 = vrot.lane.b32.xlu0 %v2160_v51, %s2279_s15 }
 0x7ad   :  { %v544_v52 = vpop.permute.xlu1 %543 }
 0x7ae   :  { %v546_v53 = vmul.f32 %v2154_v37, %v544_v52 }
 0x7af   :  { %v650_v55 = vpop.permute.xlu0 %649 }
 0x7b0   :  { %v658_v54 = vrot.slane %v546_v53, 4  ;;  %v652_v56 = vmul.f32 %v2156_v40, %v650_v55 }
 0x7b2   :  { %659 = vrot.lane.b32.xlu0 %v658_v54, %s2277_s8  ;;  %654 = vrot.lane.b32.xlu1 %v652_v56, %s2280_s18  ;;  %v761_v57 = vrot.slane %v652_v56, 4 }
 0x7b6   :  { %762 = vrot.lane.b32.xlu1 %v761_v57, %s2280_s18 }
 0x824   :  { %v660_v58 = vpop.permute.xlu0 %659  ;;  %v655_v59 = vpop.permute.xlu1 %654 }
 0x825   :  { %v662_v60 = vsel %vm128_vm3, %v655_v59, %v660_v58 }
 0x826   :  { %v664_v61 = vrot.slane %v662_v60, 4 }
 0x828   :  { %2022 = vmatmul.mubr.msk.f32.vlgmr.msra.gmra.mxu0 %vm238_vm4, %v664_v61  ;;  %v763_v62 = vpop.permute.xlu1 %762 }
 0x829   :  { %2029 = vmatmul.mubr.msk.f32.vlgmr.msra.gmra.mxu1 %vm128_vm3, %v763_v62  ;;  %2043 = vmatpush3.msra.mxu0 %v2330_v4 }
 0x82a   :  { %2032 = vmatpush3.msra.mxu1 %v2372_v25  ;;  %2044 = vmatprep.subr.mxu0 %v2275_v3 }
 0x82b   :  { %2033 = vmatprep.subr.mxu1 %v2275_v3  ;;  %2039 = vmatprep.mubr.msk.f32.mxu1 %vm2276_vm2, %v2275_v3 }
 0x82c   :  { %2034 = vmatpush3.msra.mxu1 %v2377_v26  ;;  %2045 = vmatpush3.msra.mxu0 %v2338_v6 }
 0x82d   :  { %2035 = vmatprep.subr.mxu1 %v2275_v3  ;;  %2046 = vmatprep.mubr.msk.f32.mxu0 %vm2276_vm2, %v2275_v3 }
 0x82e   :  { %2036 = vmatpush3.msra.mxu1 %v2384_v27  ;;  %2049 = vmatprep.subr.mxu0 %v2275_v3 }
 0x82f   :  { %2037 = vmatprep.subr.mxu1 %v2275_v3 }
 0x830   :  { %2038 = vmatpush3.msra.mxu1 %v2394_v29 }
 0x831   :  { %2060 = vmatprep.subr.mxu1 %v2275_v3 }
 0x8e8   :  { %v733_v63 = vpop.f32.mrf.mxu0 }
 0x8e9   :  { %v734_v0 = vadd.f32 %v2421_v34, %v733_v63  ;;  %v832_v1 = vpop.f32.mrf.mxu1 }
 0x8ea   :  { %v837_v2 = vrot.slane %v832_v1, 2  ;;  %v2023_v5 = vpop.f32.mrf.mxu0 }
 0x8eb   :  { %2161 = vtanh.f32 %v734_v0  ;;  %v2030_v7 = vpop.f32.mrf.mxu1  ;;  %v1874_v13 = vmul.f32 -1.442695, %v734_v0 }
 0x8ec   :  { %v839_v8 = vadd.f32 %v837_v2, %v2361_v12 }
 0x8ee   :  { %2163 = vtanh.f32 %v839_v8  ;;  %v1876_v14 = vmul.f32 -1.442695, %v839_v8 }
 0x8ef   :  { %2165 = vpow2.f32 %v1874_v13 }
 0x8f0   :  { %2167 = vpow2.f32 %v1876_v14 }
 0x8f8   :  { %v2162_v10 = vpop.eup %2161 }
 0x8f9   :  { %746 = vrot.lane.b32.xlu0 %v2162_v10, %s2277_s8 }
 0x8fb   :  { %v2164_v11 = vpop.eup %2163 }
 0x8fc   :  { %852 = vrot.lane.b32.xlu1 %v2164_v11, %s2277_s8  ;;  %v2166_v15 = vpop.eup %2165 }
 0x8fd   :  { %v2168_v16 = vpop.eup %2167  ;;  %v740_v17 = vadd.f32 1.0, %v2166_v15 }
 0x8fe   :  { %v843_v18 = vadd.f32 1.0, %v2168_v16 }
 0x8ff   :  { %2169 = vrcp.f32 %v740_v17 }
 0x900   :  { %2171 = vrcp.f32 %v843_v18 }
 0x90c   :  { %v2170_v19 = vpop.eup %2169 }
 0x90d   :  { %v2172_v21 = vpop.eup %2171  ;;  %v744_v24 = vmul.f32 %v2170_v19, %v2468_v46 }
 0x90e   :  { %v850_v32 = vmul.f32 %v2172_v21, %v848_v28 }
 0x96b   :  { %v747_v20 = vpop.permute.xlu0 %746 }
 0x96c   :  { %v749_v12 = vmul.f32 %v2170_v19, %v747_v20 }
 0x96e   :  { %751 = vrot.lane.b32.xlu0 %v749_v12, %s2278_s3  ;;  %v853_v22 = vpop.permute.xlu1 %852 }
 0x96f   :  { %v855_v23 = vmul.f32 %v2172_v21, %v853_v22 }
 0x971   :  { %857 = vrot.lane.b32.xlu1 %v855_v23, %s2278_s3 }
 0x9e0   :  { %v752_v30 = vpop.permute.xlu0 %751 }
 0x9e1   :  { %v2506_v31 = vadd.f32 %v752_v30, %v744_v24 }
 0x9e3   :  { %2173 = vtanh.f32 %v2506_v31  ;;  %v858_v33 = vpop.permute.xlu1 %857 }
 0x9e4   :  { %v2509_v35 = vadd.f32 %v858_v33, %v850_v32 }
 0x9e6   :  { %2175 = vtanh.f32 %v2509_v35  ;;  %v1059_v8 = vrot.slane %v2509_v35, 6 }
 0x9f0   :  { %v2174_v36 = vpop.eup %2173 }
 0x9f1   :  { %757 = vrot.lane.b32.xlu0 %v2174_v36, %s2279_s15 }
 0x9f3   :  { %v2176_v37 = vpop.eup %2175 }
 0x9f4   :  { %863 = vrot.lane.b32.xlu1 %v2176_v37, %s2279_s15 }
 0xa63   :  { %v758_v38 = vpop.permute.xlu0 %757 }
 0xa64   :  { %v760_v39 = vmul.f32 %v2170_v19, %v758_v38 }
 0xa66   :  { %v872_v40 = vrot.slane %v760_v39, 2  ;;  %v864_v41 = vpop.permute.xlu1 %863 }
 0xa67   :  { %v866_v42 = vmul.f32 %v2172_v21, %v864_v41 }
 0xa68   :  { %873 = vrot.lane.b32.xlu1 %v872_v40, %s2277_s8 }
 0xa69   :  { %868 = vrot.lane.b32.xlu0 %v866_v42, %s2280_s18  ;;  %v975_v43 = vrot.slane %v866_v42, 6 }
 0xa6d   :  { %976 = vrot.lane.b32.xlu0 %v975_v43, %s2280_s18 }
 0xada   :  { %v874_v44 = vpop.permute.xlu1 %873 }
 0xadb   :  { %v869_v45 = vpop.permute.xlu0 %868 }
 0xadc   :  { %v876_v46 = vsel %vm128_vm3, %v869_v45, %v874_v44 }
 0xadd   :  { %v878_v47 = vrot.slane %v876_v46, 6 }
 0xadf   :  { %v977_v48 = vpop.permute.xlu0 %976  ;;  %2040 = vmatmul.mubr.msk.f32.vlgmr.msra.gmra.mxu1 %vm238_vm4, %v878_v47 }
 0xae0   :  { %2047 = vmatmul.mubr.msk.f32.vlgmr.msra.gmra.mxu0 %vm128_vm3, %v977_v48  ;;  %2061 = vmatpush3.msra.mxu1 %v2330_v4 }
 0xae1   :  { %2050 = vmatpush3.msra.mxu0 %v2372_v25  ;;  %2062 = vmatprep.subr.mxu1 %v2275_v3 }
 0xae2   :  { %2051 = vmatprep.subr.mxu0 %v2275_v3  ;;  %2063 = vmatpush3.msra.mxu1 %v2338_v6 }
 0xae3   :  { %2052 = vmatpush3.msra.mxu0 %v2377_v26  ;;  %2064 = vmatprep.mubr.msk.f32.mxu1 %vm2276_vm2, %v2275_v3 }
 0xae4   :  { %2053 = vmatprep.subr.mxu0 %v2275_v3  ;;  %2057 = vmatprep.mubr.msk.f32.mxu0 %vm2276_vm2, %v2275_v3 }
 0xae5   :  { %2054 = vmatpush3.msra.mxu0 %v2384_v27  ;;  %2067 = vmatprep.subr.mxu1 %v2275_v3 }
 0xae6   :  { %2055 = vmatprep.subr.mxu0 %v2275_v3 }
 0xae7   :  { %2056 = vmatpush3.msra.mxu0 %v2394_v29 }
 0xae8   :  { %2078 = vmatprep.subr.mxu0 %v2275_v3 }
 0xb9f   :  { %v947_v49 = vpop.f32.mrf.mxu1 }
 0xba0   :  { %v948_v50 = vadd.f32 %v2421_v34, %v947_v49  ;;  %v1046_v51 = vpop.f32.mrf.mxu0 }
 0xba1   :  { %v1050_v52 = vadd.f32 %v1046_v51, %v2359_v9  ;;  %v2041_v53 = vpop.f32.mrf.mxu1 }
 0xba2   :  { %2177 = vtanh.f32 %v948_v50  ;;  %v2048_v54 = vpop.f32.mrf.mxu0  ;;  %v1878_v57 = vmul.f32 -1.442695, %v948_v50 }
 0xba3   :  { %2179 = vtanh.f32 %v1050_v52  ;;  %v1880_v58 = vmul.f32 -1.442695, %v1050_v52 }
 0xba4   :  { %2181 = vpow2.f32 %v1878_v57 }
 0xba5   :  { %2183 = vpow2.f32 %v1880_v58 }
 0xbaf   :  { %v2178_v55 = vpop.eup %2177 }
 0xbb0   :  { %v2180_v56 = vpop.eup %2179  ;;  %960 = vrot.lane.b32.xlu1 %v2178_v55, %s2277_s8 }
 0xbb1   :  { %1063 = vrot.lane.b32.xlu0 %v2180_v56, %s2277_s8  ;;  %v2182_v59 = vpop.eup %2181 }
 0xbb2   :  { %v2184_v60 = vpop.eup %2183  ;;  %v954_v61 = vadd.f32 1.0, %v2182_v59 }
 0xbb3   :  { %v1054_v62 = vadd.f32 1.0, %v2184_v60 }
 0xbb4   :  { %2185 = vrcp.f32 %v954_v61 }
 0xbb5   :  { %2187 = vrcp.f32 %v1054_v62 }
 0xbc1   :  { %v2186_v63 = vpop.eup %2185 }
 0xbc2   :  { %v2188_v1 = vpop.eup %2187  ;;  %v958_v10 = vmul.f32 %v2186_v63, %v2506_v31 }
 0xbc3   :  { %v1061_v13 = vmul.f32 %v2188_v1, %v1059_v8 }
 0xc22   :  { %v961_v0 = vpop.permute.xlu1 %960 }
 0xc23   :  { %v963_v2 = vmul.f32 %v2186_v63, %v961_v0  ;;  %v1064_v5 = vpop.permute.xlu0 %1063 }
 0xc24   :  { %v1066_v7 = vmul.f32 %v2188_v1, %v1064_v5 }
 0xc25   :  { %965 = vrot.lane.b32.xlu1 %v963_v2, %s2278_s3 }
 0xc26   :  { %1068 = vrot.lane.b32.xlu0 %v1066_v7, %s2278_s3 }
 0xc97   :  { %v966_v11 = vpop.permute.xlu1 %965 }
 0xc98   :  { %v2544_v14 = vadd.f32 %v966_v11, %v958_v10  ;;  %v1069_v15 = vpop.permute.xlu0 %1068 }
 0xc99   :  { %v2546_v16 = vadd.f32 %v1069_v15, %v1061_v13 }
 0xc9a   :  { %2189 = vtanh.f32 %v2544_v14 }
 0xc9b   :  { %2191 = vtanh.f32 %v2546_v16  ;;  %v1268_v51 = vrot.slane %v2546_v16, 6 }
 0xca7   :  { %v2190_v17 = vpop.eup %2189 }
 0xca8   :  { %v2192_v18 = vpop.eup %2191  ;;  %971 = vrot.lane.b32.xlu1 %v2190_v17, %s2279_s15 }
 0xca9   :  { %1074 = vrot.lane.b32.xlu0 %v2192_v18, %s2279_s15 }
 0xd1a   :  { %v972_v19 = vpop.permute.xlu1 %971 }
 0xd1b   :  { %v974_v20 = vmul.f32 %v2186_v63, %v972_v19  ;;  %v1075_v12 = vpop.permute.xlu0 %1074 }
 0xd1c   :  { %v1077_v21 = vmul.f32 %v2188_v1, %v1075_v12 }
 0xd1d   :  { %1083 = vrot.lane.b32.xlu0 %v974_v20, %s2277_s8 }
 0xd1e   :  { %1079 = vrot.lane.b32.xlu1 %v1077_v21, %s2280_s18 }
 0xd8f   :  { %v1084_v22 = vpop.permute.xlu0 %1083 }
 0xd90   :  { %v1080_v23 = vpop.permute.xlu1 %1079 }
 0xd91   :  { %v1086_v24 = vsel %vm128_vm3, %v1080_v23, %v1084_v22  ;;  %2065 = vmatmul.mubr.msk.f32.vlgmr.msra.gmra.mxu1 %vm128_vm3, %v1080_v23 }
 0xd92   :  { %2058 = vmatmul.mubr.msk.f32.vlgmr.msra.gmra.mxu0 %vm238_vm4, %v1086_v24  ;;  %2068 = vmatpush3.msra.mxu1 %v2372_v25 }
 0xd93   :  { %2069 = vmatprep.subr.mxu1 %v2275_v3  ;;  %2079 = vmatpush3.msra.mxu0 %v2330_v4 }
 0xd94   :  { %2070 = vmatpush3.msra.mxu1 %v2377_v26  ;;  %2080 = vmatprep.subr.mxu0 %v2275_v3 }
 0xd95   :  { %2071 = vmatprep.subr.mxu1 %v2275_v3  ;;  %2081 = vmatpush3.msra.mxu0 %v2338_v6 }
 0xd96   :  { %2072 = vmatpush3.msra.mxu1 %v2384_v27  ;;  %2075 = vmatprep.mubr.msk.f32.mxu1 %vm2276_vm2, %v2275_v3 }
 0xd97   :  { %2073 = vmatprep.subr.mxu1 %v2275_v3  ;;  %2082 = vmatprep.mubr.msk.f32.mxu0 %vm2276_vm2, %v2275_v3 }
 0xd98   :  { %2074 = vmatpush3.msra.mxu1 %v2394_v29  ;;  %2085 = vmatprep.subr.mxu0 %v2275_v3 }
 0xd99   :  { %2096 = vmatprep.subr.mxu1 %v2275_v3 }
 0xe51   :  { %v1252_v28 = vpop.f32.mrf.mxu1 }
 0xe52   :  { %v1257_v30 = vrot.slane %v1252_v28, 6  ;;  %v1156_v31 = vpop.f32.mrf.mxu0 }
 0xe53   :  { %v1157_v32 = vadd.f32 %v2421_v34, %v1156_v31  ;;  %v2066_v33 = vpop.f32.mrf.mxu1 }
 0xe54   :  { %v1259_v35 = vadd.f32 %v1257_v30, %v2359_v9  ;;  %v2059_v36 = vpop.f32.mrf.mxu0 }
 0xe55   :  { %2193 = vtanh.f32 %v1157_v32  ;;  %v1882_v39 = vmul.f32 -1.442695, %v1157_v32 }
 0xe56   :  { %2195 = vtanh.f32 %v1259_v35  ;;  %v1884_v40 = vmul.f32 -1.442695, %v1259_v35 }
 0xe57   :  { %2197 = vpow2.f32 %v1882_v39 }
 0xe58   :  { %2199 = vpow2.f32 %v1884_v40 }
 0xe62   :  { %v2194_v37 = vpop.eup %2193 }
 0xe63   :  { %v2196_v38 = vpop.eup %2195  ;;  %1169 = vrot.lane.b32.xlu1 %v2194_v37, %s2277_s8 }
 0xe64   :  { %1272 = vrot.lane.b32.xlu0 %v2196_v38, %s2277_s8  ;;  %v2198_v41 = vpop.eup %2197 }
 0xe65   :  { %v2200_v42 = vpop.eup %2199  ;;  %v1163_v43 = vadd.f32 1.0, %v2198_v41 }
 0xe66   :  { %v1263_v44 = vadd.f32 1.0, %v2200_v42 }
 0xe67   :  { %2201 = vrcp.f32 %v1163_v43 }
 0xe68   :  { %2203 = vrcp.f32 %v1263_v44 }
 0xe74   :  { %v2202_v45 = vpop.eup %2201 }
 0xe75   :  { %v2204_v47 = vpop.eup %2203  ;;  %v1167_v52 = vmul.f32 %v2202_v45, %v2544_v14 }
 0xe76   :  { %v1270_v54 = vmul.f32 %v2204_v47, %v1268_v51 }
 0xed5   :  { %v1170_v46 = vpop.permute.xlu1 %1169 }
 0xed6   :  { %v1172_v48 = vmul.f32 %v2202_v45, %v1170_v46  ;;  %v1273_v49 = vpop.permute.xlu0 %1272 }
 0xed7   :  { %v1275_v50 = vmul.f32 %v2204_v47, %v1273_v49 }
 0xed8   :  { %1174 = vrot.lane.b32.xlu1 %v1172_v48, %s2278_s3 }
 0xed9   :  { %1277 = vrot.lane.b32.xlu0 %v1275_v50, %s2278_s3 }
 0xf4a   :  { %v1175_v53 = vpop.permute.xlu1 %1174 }
 0xf4b   :  { %v2581_v55 = vadd.f32 %v1175_v53, %v1167_v52  ;;  %v1278_v56 = vpop.permute.xlu0 %1277 }
 0xf4c   :  { %v2583_v57 = vadd.f32 %v1278_v56, %v1270_v54 }
 0xf4d   :  { %2205 = vtanh.f32 %v2581_v55 }
 0xf4e   :  { %2207 = vtanh.f32 %v2583_v57  ;;  %v1482_v36 = vrot.slane %v2583_v57, 6 }
 0xf5a   :  { %v2206_v58 = vpop.eup %2205 }
 0xf5b   :  { %v2208_v59 = vpop.eup %2207  ;;  %1180 = vrot.lane.b32.xlu1 %v2206_v58, %s2279_s15 }
 0xf5c   :  { %1283 = vrot.lane.b32.xlu0 %v2208_v59, %s2279_s15 }
 0xfcd   :  { %v1181_v60 = vpop.permute.xlu1 %1180 }
 0xfce   :  { %v1183_v61 = vmul.f32 %v2202_v45, %v1181_v60  ;;  %v1284_v62 = vpop.permute.xlu0 %1283 }
 0xfcf   :  { %v1286_v63 = vmul.f32 %v2204_v47, %v1284_v62 }
 0xfd0   :  { %v1292_v0 = vrot.slane %v1183_v61, 6 }
 0xfd1   :  { %1288 = vrot.lane.b32.xlu1 %v1286_v63, %s2280_s18  ;;  %v1395_v1 = vrot.slane %v1286_v63, 2 }
 0xfd2   :  { %1293 = vrot.lane.b32.xlu0 %v1292_v0, %s2277_s8 }
 0xfd5   :  { %1396 = vrot.lane.b32.xlu1 %v1395_v1, %s2280_s18 }
0x1043   :  { %v1289_v2 = vpop.permute.xlu1 %1288 }
0x1044   :  { %v1294_v5 = vpop.permute.xlu0 %1293 }
0x1045   :  { %v1296_v7 = vsel %vm128_vm3, %v1289_v2, %v1294_v5 }
0x1046   :  { %v1298_v8 = vrot.slane %v1296_v7, 2 }
0x1047   :  { %v1397_v10 = vpop.permute.xlu1 %1396 }
0x1048   :  { %2076 = vmatmul.mubr.msk.f32.vlgmr.msra.gmra.mxu1 %vm238_vm4, %v1298_v8  ;;  %2083 = vmatmul.mubr.msk.f32.vlgmr.msra.gmra.mxu0 %vm128_vm3, %v1397_v10 }
0x1049   :  { %2086 = vmatpush3.msra.mxu0 %v2372_v25  ;;  %2097 = vmatpush3.msra.mxu1 %v2330_v4 }
0x104a   :  { %2087 = vmatprep.subr.mxu0 %v2275_v3  ;;  %2098 = vmatprep.subr.mxu1 %v2275_v3 }
0x104b   :  { %2088 = vmatpush3.msra.mxu0 %v2377_v26  ;;  %2093 = vmatprep.mubr.msk.f32.mxu0 %vm2276_vm2, %v2275_v3 }
0x104c   :  { %2089 = vmatprep.subr.mxu0 %v2275_v3  ;;  %2099 = vmatpush3.msra.mxu1 %v2338_v6 }
0x104d   :  { %2090 = vmatpush3.msra.mxu0 %v2384_v27  ;;  %2100 = vmatprep.mubr.msk.f32.mxu1 %vm2276_vm2, %v2275_v3 }
0x104e   :  { %2091 = vmatprep.subr.mxu0 %v2275_v3  ;;  %2103 = vmatprep.subr.mxu1 %v2275_v3 }
0x104f   :  { %2092 = vmatpush3.msra.mxu0 %v2394_v29 }
0x1108   :  { %v1367_v4 = vpop.f32.mrf.mxu1  ;;  %v1466_v11 = vpop.f32.mrf.mxu0 }
0x1109   :  { %v1368_v13 = vadd.f32 %v2421_v34, %v1367_v4  ;;  %v1471_v14 = vrot.slane %v1466_v11, 4 }
0x110a   :  { %v2077_v15 = vpop.f32.mrf.mxu1  ;;  %v2084_v16 = vpop.f32.mrf.mxu0 }
0x110b   :  { %2209 = vtanh.f32 %v1368_v13  ;;  %v1473_v6 = vadd.f32 %v1471_v14, %v2359_v9  ;;  %v1886_v19 = vmul.f32 -1.442695, %v1368_v13 }
0x110d   :  { %2211 = vtanh.f32 %v1473_v6  ;;  %v1888_v20 = vmul.f32 -1.442695, %v1473_v6 }
0x110e   :  { %2213 = vpow2.f32 %v1886_v19 }
0x110f   :  { %2215 = vpow2.f32 %v1888_v20 }
0x1118   :  { %v2210_v17 = vpop.eup %2209 }
0x1119   :  { %1380 = vrot.lane.b32.xlu0 %v2210_v17, %s2277_s8 }
0x111a   :  { %v2212_v18 = vpop.eup %2211 }
0x111b   :  { %1486 = vrot.lane.b32.xlu1 %v2212_v18, %s2277_s8  ;;  %v2214_v12 = vpop.eup %2213 }
0x111c   :  { %v2216_v21 = vpop.eup %2215  ;;  %v1374_v22 = vadd.f32 1.0, %v2214_v12 }
0x111d   :  { %v1477_v23 = vadd.f32 1.0, %v2216_v21 }
0x111e   :  { %2217 = vrcp.f32 %v1374_v22 }
0x111f   :  { %2219 = vrcp.f32 %v1477_v23 }
0x112b   :  { %v2218_v24 = vpop.eup %2217 }
0x112c   :  { %v2220_v31 = vpop.eup %2219  ;;  %v1378_v35 = vmul.f32 %v2218_v24, %v2581_v55 }
0x112d   :  { %v1484_v39 = vmul.f32 %v2220_v31, %v1482_v36 }
0x118b   :  { %v1381_v28 = vpop.permute.xlu0 %1380 }
0x118c   :  { %v1383_v30 = vmul.f32 %v2218_v24, %v1381_v28 }
0x118d   :  { %v1487_v32 = vpop.permute.xlu1 %1486 }
0x118e   :  { %1385 = vrot.lane.b32.xlu0 %v1383_v30, %s2278_s3  ;;  %v1489_v33 = vmul.f32 %v2220_v31, %v1487_v32 }
0x1190   :  { %1491 = vrot.lane.b32.xlu1 %v1489_v33, %s2278_s3 }
0x1200   :  { %v1386_v37 = vpop.permute.xlu0 %1385 }
0x1201   :  { %v2618_v38 = vadd.f32 %v1386_v37, %v1378_v35 }
0x1202   :  { %v1492_v40 = vpop.permute.xlu1 %1491 }
0x1203   :  { %2221 = vtanh.f32 %v2618_v38  ;;  %v2621_v41 = vadd.f32 %v1492_v40, %v1484_v39 }
0x1205   :  { %2223 = vtanh.f32 %v2621_v41  ;;  %v1696_v4 = vrot.slane %v2621_v41, 6 }
0x1210   :  { %v2222_v42 = vpop.eup %2221 }
0x1211   :  { %1391 = vrot.lane.b32.xlu0 %v2222_v42, %s2279_s15 }
0x1212   :  { %v2224_v43 = vpop.eup %2223 }
0x1213   :  { %1497 = vrot.lane.b32.xlu1 %v2224_v43, %s2279_s15 }
0x1283   :  { %v1392_v44 = vpop.permute.xlu0 %1391 }
0x1284   :  { %v1394_v45 = vmul.f32 %v2218_v24, %v1392_v44 }
0x1285   :  { %v1498_v47 = vpop.permute.xlu1 %1497 }
0x1286   :  { %v1506_v46 = vrot.slane %v1394_v45, 4  ;;  %v1500_v48 = vmul.f32 %v2220_v31, %v1498_v47 }
0x1288   :  { %1507 = vrot.lane.b32.xlu1 %v1506_v46, %s2277_s8  ;;  %1502 = vrot.lane.b32.xlu0 %v1500_v48, %s2280_s18  ;;  %v1609_v49 = vrot.slane %v1500_v48, 4 }
0x128c   :  { %1610 = vrot.lane.b32.xlu0 %v1609_v49, %s2280_s18 }
0x12fa   :  { %v1508_v50 = vpop.permute.xlu1 %1507  ;;  %v1503_v51 = vpop.permute.xlu0 %1502 }
0x12fb   :  { %v1510_v52 = vsel %vm128_vm3, %v1503_v51, %v1508_v50 }
0x12fc   :  { %v1512_v53 = vrot.slane %v1510_v52, 4 }
0x12fe   :  { %2094 = vmatmul.mubr.msk.f32.vlgmr.msra.gmra.mxu0 %vm238_vm4, %v1512_v53  ;;  %v1611_v54 = vpop.permute.xlu0 %1610 }
0x12ff   :  { %2101 = vmatmul.mubr.msk.f32.vlgmr.msra.gmra.mxu1 %vm128_vm3, %v1611_v54 }
0x1300   :  { %2104 = vmatpush3.msra.mxu1 %v2372_v25  ;;  %2111 = vmatprep.mubr.msk.f32.mxu1 %vm2276_vm2, %v2275_v3 }
0x1301   :  { %2105 = vmatprep.subr.mxu1 %v2275_v3 }
0x1302   :  { %2106 = vmatpush3.msra.mxu1 %v2377_v26 }
0x1303   :  { %2107 = vmatprep.subr.mxu1 %v2275_v3 }
0x1304   :  { %2108 = vmatpush3.msra.mxu1 %v2384_v27 }
0x1305   :  { %2109 = vmatprep.subr.mxu1 %v2275_v3 }
0x1306   :  { %2110 = vmatpush3.msra.mxu1 %v2394_v29 }
0x13be   :  { %v1581_v55 = vpop.f32.mrf.mxu0 }
0x13bf   :  { %v1582_v56 = vadd.f32 %v2421_v34, %v1581_v55  ;;  %v1680_v57 = vpop.f32.mrf.mxu1 }
0x13c0   :  { %v1685_v25 = vrot.slane %v1680_v57, 2  ;;  %v2095_v58 = vpop.f32.mrf.mxu0 }
0x13c1   :  { %2225 = vtanh.f32 %v1582_v56  ;;  %v2102_v59 = vpop.f32.mrf.mxu1  ;;  %v1890_v3 = vmul.f32 -1.442695, %v1582_v56 }
0x13c2   :  { %v1687_v60 = vadd.f32 %v1685_v25, %v2359_v9 }
0x13c4   :  { %2227 = vtanh.f32 %v1687_v60  ;;  %v1892_v27 = vmul.f32 -1.442695, %v1687_v60 }
0x13c5   :  { %2229 = vpow2.f32 %v1890_v3 }
0x13c6   :  { %2231 = vpow2.f32 %v1892_v27 }
0x13ce   :  { %v2226_v26 = vpop.eup %2225 }
0x13cf   :  { %1594 = vrot.lane.b32.xlu1 %v2226_v26, %s2277_s8 }
0x13d1   :  { %v2228_v61 = vpop.eup %2227 }
0x13d2   :  { %1700 = vrot.lane.b32.xlu0 %v2228_v61, %s2277_s8  ;;  %v2230_v29 = vpop.eup %2229 }
0x13d3   :  { %v2232_v62 = vpop.eup %2231  ;;  %v1588_v63 = vadd.f32 1.0, %v2230_v29 }
0x13d4   :  { %v1691_v0 = vadd.f32 1.0, %v2232_v62 }
0x13d5   :  { %2233 = vrcp.f32 %v1588_v63 }
0x13d6   :  { %2235 = vrcp.f32 %v1691_v0 }
0x13e2   :  { %v2234_v1 = vpop.eup %2233 }
0x13e3   :  { %v2236_v5 = vpop.eup %2235  ;;  %v1592_v10 = vmul.f32 %v2234_v1, %v2618_v38 }
0x13e4   :  { %v1698_v14 = vmul.f32 %v2236_v5, %v1696_v4 }
0x1441   :  { %v1595_v2 = vpop.permute.xlu1 %1594 }
0x1442   :  { %v1597_v9 = vmul.f32 %v2234_v1, %v1595_v2 }
0x1444   :  { %1599 = vrot.lane.b32.xlu1 %v1597_v9, %s2278_s3  ;;  %v1701_v7 = vpop.permute.xlu0 %1700 }
0x1445   :  { %v1703_v8 = vmul.f32 %v2236_v5, %v1701_v7 }
0x1447   :  { %1705 = vrot.lane.b32.xlu0 %v1703_v8, %s2278_s3 }
0x14b6   :  { %v1600_v11 = vpop.permute.xlu1 %1599 }
0x14b7   :  { %v1602_v13 = vadd.f32 %v1600_v11, %v1592_v10 }
0x14b9   :  { %2237 = vtanh.f32 %v1602_v13  ;;  %v1706_v15 = vpop.permute.xlu0 %1705 }
0x14ba   :  { %v1708_v16 = vadd.f32 %v1706_v15, %v1698_v14 }
0x14bc   :  { %2239 = vtanh.f32 %v1708_v16 }
0x14c6   :  { %v2238_v6 = vpop.eup %2237 }
0x14c7   :  { %1605 = vrot.lane.b32.xlu1 %v2238_v6, %s2279_s15 }
0x14c9   :  { %v2240_v17 = vpop.eup %2239 }
0x14ca   :  { %1711 = vrot.lane.b32.xlu0 %v2240_v17, %s2279_s15 }
0x1539   :  { %v1606_v18 = vpop.permute.xlu1 %1605 }
0x153a   :  { %v1608_v19 = vmul.f32 %v2234_v1, %v1606_v18 }
0x153c   :  { %v1720_v20 = vrot.slane %v1608_v19, 2  ;;  %v1712_v12 = vpop.permute.xlu0 %1711 }
0x153d   :  { %v1714_v21 = vmul.f32 %v2236_v5, %v1712_v12 }
0x153e   :  { %1721 = vrot.lane.b32.xlu0 %v1720_v20, %s2277_s8 }
0x153f   :  { %1716 = vrot.lane.b32.xlu1 %v1714_v21, %s2280_s18 }
0x15b0   :  { %v1722_v22 = vpop.permute.xlu0 %1721 }
0x15b1   :  { %v1717_v23 = vpop.permute.xlu1 %1716 }
0x15b2   :  { %v1724_v24 = vsel %vm128_vm3, %v1717_v23, %v1722_v22 }
0x15b3   :  { %v1726_v28 = vrot.slane %v1724_v24, 6 }
0x15b5   :  { %2112 = vmatmul.mubr.msk.f32.vlgmr.msra.gmra.mxu1 %vm238_vm4, %v1726_v28 }
0x1675   :  { %v1795_v30 = vpop.f32.mrf.mxu1 }
0x1676   :  { %v1796_v31 = vadd.f32 %v2421_v34, %v1795_v30 }
0x1677   :  { %v2113_v32 = vpop.f32.mrf.mxu1 }
0x1678   :  { %2241 = vtanh.f32 %v1796_v31  ;;  %v1894_v35 = vmul.f32 -1.442695, %v1796_v31 }
0x167a   :  { %2243 = vpow2.f32 %v1894_v35 }
0x1685   :  { %v2242_v33 = vpop.eup %2241 }
0x1686   :  { %1808 = vrot.lane.b32.xlu1 %v2242_v33, %s2277_s8 }
0x1687   :  { %v2244_v36 = vpop.eup %2243 }
0x1688   :  { %v1802_v37 = vadd.f32 1.0, %v2244_v36 }
0x168a   :  { %2245 = vrcp.f32 %v1802_v37 }
0x1697   :  { %v2246_v38 = vpop.eup %2245 }
0x1698   :  { %v1806_v41 = vmul.f32 %v2246_v38, %v1602_v13 }
0x16f8   :  { %v1809_v39 = vpop.permute.xlu1 %1808 }
0x16f9   :  { %v1811_v40 = vmul.f32 %v2246_v38, %v1809_v39 }
0x16fb   :  { %1813 = vrot.lane.b32.xlu0 %v1811_v40, %s2278_s3 }
0x176d   :  { %v1814_v42 = vpop.permute.xlu0 %1813 }
0x176e   :  { %v1816_v43 = vadd.f32 %v1814_v42, %v1806_v41 }
0x1770   :  { %2247 = vtanh.f32 %v1816_v43 }
0x177d   :  { %v2248_v34 = vpop.eup %2247 }
0x177e   :  { %1819 = vrot.lane.b32.xlu1 %v2248_v34, %s2279_s15 }
0x17f0   :  { %v1820_v44 = vpop.permute.xlu1 %1819 }
0x17f1   :  { %v1822_v45 = vmul.f32 %v2246_v38, %v1820_v44 }
0x17f3   :  { %v1824_v46 = vsel %vm1823_vm5, %v1822_v45, -inf }
0x17f4   :  { %1825 = vmax.xlane.f32.xlu0 %v1824_v46 }
0x187d   :  { %v1826_v47 = vpop.xlane.xlu0 %1825 }
0x187e   :  { %v1827_v48 = vsub.f32 %v1822_v45, %v1826_v47 }
0x1880   :  { %v1828_v49 = vmul.f32 1.442695, %v1827_v48 }
0x1882   :  { %2249 = vpow2.f32 %v1828_v49 }
0x188f   :  { %v2250_v50 = vpop.eup %2249 }
0x1890   :  { %1831 = vrot.lane.b32.xlu1 %v2250_v50, %s2280_s18 }
0x1902   :  { %v1832_v51 = vpop.permute.xlu1 %1831 }
0x1903   :  { %v1835_v52 = vsel %vm1834_vm6, %v1832_v51, 0.0 }
0x1904   :  { %1836 = vadd.xlane.f32.xlu1 %v1835_v52 }
0x198d   :  { %v1837_v53 = vpop.xlane.xlu1 %1836 }
0x198e   :  { %2251 = vrcp.f32 %v1837_v53 }
0x199b   :  { %v2252_v54 = vpop.eup %2251 }
0x199c   :  { %v1839_v55 = vmul.f32 %v2252_v54, %v2250_v50 }
0x199e   :  { %1841 = vrot.lane.b32.xlu0 %v1839_v55, %s2280_s18 }
0x1a10   :  { %v1842_v56 = vpop.permute.xlu0 %1841 }
0x1a11   :  { %1844 = vst.msk [vmem:[#allocation2] sm:$0x3] %vm1834_vm6, %v1842_v56 }
0x1a12   :  { %2264 = shalt.err (!%p2261_p4)
}
0x1a13   :  { %1854 = dma.vmem_to_hbm [thread:$0]  %s1852_s20, 32, %s2670_s6, [#allocation3]  }
0x1a14   :  { %2273 = dma.done.wait [#allocation3], 32  }
0x1a15   :  { %2274 = vsyncadd [#allocation3], 4294967264 }
0x1a16   :  { %1858 = vsyncpa [#allocation3], 1 }

</bundles_post_ra>
